<compile_context>
chip_gen: v7x
topology: tpu7x:2x2x1
jax: 0.10.0
libtpu: 0.0.40
codegen_flags: <defaults>
</compile_context>

<pallas_src>
import functools

import jax
import jax.numpy as jnp
from jax.experimental import pallas as pl
from jax.experimental.pallas import tpu as pltpu

_NEG = -1e30  # finite "-inf" sentinel (avoids inf-inf NaNs in the online LSE)


def _round_up(x, m):
    return ((x + m - 1) // m) * m


# ----------------------------------------------------------------------------- kernel


def _fflm_kernel(nlayers, v_tile, x_ref, y_ref, *refs):
    """Grid = (batch tiles, V tiles).  Online-LSE cross-entropy over V tiles.

    refs = [w_0, b_0, ..., w_{L-1}, b_{L-1}, wo_tile, bo_tile,   # inputs
            per_example_out,                                     # output
            h_scr, m_scr, l_scr, t_scr]                          # scratch
    """
    n_par = 2 * nlayers + 2
    param_refs = refs[:n_par]
    per_ex_ref = refs[n_par]
    h_scr, m_scr, l_scr, t_scr = refs[n_par + 1:]

    v = pl.program_id(1)
    nv = pl.num_programs(1)

    # ---- once per batch tile: FF hidden stack (bf16 matmuls, f32 acc) + LSE state init ----
    @pl.when(v == 0)
    def _():
        x = x_ref[...]                                            # (Bt, Dp) bf16
        for l in range(nlayers):
            w = param_refs[2 * l][...]                            # (Dp|Hp, Hp) bf16
            b = param_refs[2 * l + 1][...]                        # (1, Hp) f32
            h = jnp.dot(x, w, preferred_element_type=jnp.float32) + b
            x = jnp.maximum(h, 0.0).astype(jnp.bfloat16)          # ReLU in f32, store bf16
        h_scr[...] = x
        m_scr[...] = jnp.full_like(m_scr, _NEG)
        l_scr[...] = jnp.zeros_like(l_scr)
        t_scr[...] = jnp.zeros_like(t_scr)

    # ---- per V tile: logits tile + online log-sum-exp update + fused target select ----
    wo = param_refs[2 * nlayers][...]                             # (Hp, Vt) bf16
    bo = param_refs[2 * nlayers + 1][...]                         # (1, Vt) f32 (-1e30 in padding)
    logits = jnp.dot(h_scr[...], wo, preferred_element_type=jnp.float32) + bo  # (Bt, Vt) f32

    m_prev = m_scr[...]
    m_new = jnp.maximum(m_prev, jnp.max(logits, axis=-1, keepdims=True))
    alpha = jnp.exp(m_prev - m_new)
    p = jnp.exp(logits - m_new)
    l_scr[...] = alpha * l_scr[...] + jnp.sum(p, axis=-1, keepdims=True)
    m_scr[...] = m_new

    # Target select: (1, Vt) iota vs (Bt, 1) tile-local target index (broadcast compare) —
    # avoids materializing a full (Bt, Vt) iota and a full-tile add per grid step.
    col = jax.lax.broadcasted_iota(jnp.int32, (1, v_tile), 1)
    y_local = y_ref[...] - v * v_tile                             # (Bt, 1) int32
    t_scr[...] += jnp.sum(jnp.where(col == y_local, logits, 0.0), axis=-1, keepdims=True)

    # ---- finalize on the last V tile: per-example NLL, lane-broadcast (dense stores) ----
    @pl.when(v == nv - 1)
    def _():
        per_ex = (m_scr[...] + jnp.log(l_scr[...])) - t_scr[...]  # (Bt, 1)
        per_ex_ref[...] = jnp.broadcast_to(per_ex, per_ex_ref.shape)


# ----------------------------------------------------------------------------- wrapper


def prepare_fflm_params(params, *, nhis, wdim, block_v=512, align=256):
    """Pad/cast FFLM parameters once, outside the per-step forward.

    Re-padding per call materializes a full copy of the (H, V) output projection (the largest
    tensor) in HBM on every forward; doing it once removes that traffic.  `align` should be 256
    on v6e/v7x (2x256x256 MXU); 128 is fine on v5e.
    """
    E = params["E"]
    V = E.shape[0]
    nlayers = len(params["ff"])
    d_in = nhis * wdim
    d_h = params["ff"][0][0].shape[1] if nlayers > 0 else d_in
    d_in_p = _round_up(d_in, align)
    d_h_p = _round_up(d_h, align)
    v_tile = _round_up(min(block_v, _round_up(V, 128)), 128)
    v_pad = _round_up(V, v_tile)
    wo_rows = d_h_p if nlayers > 0 else d_in_p

    def pad2(a, rows, cols, dtype, fill=0.0):
        out = jnp.full((rows, cols), fill, dtype)
        return out.at[:a.shape[0], :a.shape[1]].set(a.astype(dtype))

    ff = []
    prev = d_in_p
    for w, b in params["ff"]:
        ff.append((pad2(w, prev, d_h_p, jnp.bfloat16),
                   pad2(b.reshape(1, -1), 1, d_h_p, jnp.float32)))
        prev = d_h_p
    wo, bo = params["out"]
    return {
        "_prepared": True,
        "E": E.astype(jnp.bfloat16),                       # bf16 halves the gather's HBM traffic
        "ff": ff,
        "wo": pad2(wo, wo_rows, v_pad, jnp.bfloat16),
        "bo": pad2(bo.reshape(1, -1), 1, v_pad, jnp.float32, fill=_NEG),  # padded vocab -> -1e30
        "V": V, "nlayers": nlayers, "d_in": d_in,
        "d_in_p": d_in_p, "d_h_p": d_h_p, "wo_rows": wo_rows,
        "v_tile": v_tile, "v_pad": v_pad,
    }


def _vmem_budget_bytes(*, b_tile, d_in_p, d_h_p, wo_rows, v_tile, nlayers, ff_buffers):
    """Estimate the kernel's VMEM footprint from the actual tile sizes (+ compiler headroom)."""
    bf, f32 = 2, 4
    ff = 0
    prev = d_in_p
    for _ in range(nlayers):
        ff += prev * d_h_p * bf + d_h_p * f32
        prev = d_h_p
    ff *= ff_buffers                                        # 1 if single-buffered, else 2
    wo = 2 * (wo_rows * v_tile * bf + v_tile * f32)         # wo/bo stream over V, double-buffered
    io = 2 * (b_tile * d_in_p * bf + b_tile * f32 + b_tile * 128 * f32)   # x, y, out tiles
    scratch = b_tile * wo_rows * bf + 3 * b_tile * f32      # h / m / l / t scratch
    temps = 3 * b_tile * v_tile * f32 + 2 * b_tile * max(d_h_p, d_in_p) * f32  # logits/p/FF temps
    return ff + wo + io + scratch + temps + (8 << 20)       # ~8 MiB compiler-internal headroom


def fflm_forward(X, Y, params, *, nhis, wdim, mean=True, block_b=512, block_v=512, align=256):
    """Pallas-backed FFLM.forward: returns the scalar CE loss (mean or sum).

    block_b guidance (the wo stream goes MXU-bound once b_tile exceeds the roofline crossover):
    v5e ~256-512, v6e ~768-1024, v7x ~384-512 (and keep >= 2 batch tiles so both TCs are used).
    """
    if not params.get("_prepared", False):
        params = prepare_fflm_params(params, nhis=nhis, wdim=wdim, block_v=block_v, align=align)
    p = params
    B = X.shape[0]
    nlayers, d_in = p["nlayers"], p["d_in"]
    d_in_p, d_h_p, wo_rows = p["d_in_p"], p["d_h_p"], p["wo_rows"]
    v_tile, v_pad = p["v_tile"], p["v_pad"]

    # TODO(synk): the data-dependent embedding gather stays in JAX glue (a per-row DMA gather is
    # not worth it at these sizes); E is already bf16 so its HBM traffic is halved.
    embeds = jnp.take(p["E"], X, axis=0).reshape(B, d_in)

    b_tile = _round_up(max(16, min(block_b, _round_up(B, 16))), 16)   # always sublane-aligned
    b_pad = _round_up(B, b_tile)

    x_p = jnp.zeros((b_pad, d_in_p), jnp.bfloat16).at[:B, :d_in].set(embeds)
    y_p = jnp.zeros((b_pad, 1), jnp.int32).at[:B, 0].set(Y.astype(jnp.int32))

    flat = []
    for w, b in p["ff"]:
        flat += [w, b]
    flat += [p["wo"], p["bo"]]

    grid = (b_pad // b_tile, v_pad // v_tile)
    kernel = functools.partial(_fflm_kernel, nlayers, v_tile)
    const_map = lambda b, v: (0, 0)              # FF weights: resident, never re-fetched

    def run(single_buffer_ff):
        specs = []
        prev = d_in_p
        for _ in range(nlayers):
            if single_buffer_ff:
                # Constant index_map over the whole grid -> the 2nd pipeline buffer is pure waste.
                specs += [pl.BlockSpec((prev, d_h_p), const_map, pipeline_mode=pl.Buffered(1)),
                          pl.BlockSpec((1, d_h_p), const_map, pipeline_mode=pl.Buffered(1))]
            else:
                specs += [pl.BlockSpec((prev, d_h_p), const_map),
                          pl.BlockSpec((1, d_h_p), const_map)]
            prev = d_h_p
        specs += [pl.BlockSpec((wo_rows, v_tile), lambda b, v: (0, v)),   # streams over V only
                  pl.BlockSpec((1, v_tile), lambda b, v: (0, v))]

        budget = _vmem_budget_bytes(
            b_tile=b_tile, d_in_p=d_in_p, d_h_p=d_h_p, wo_rows=wo_rows, v_tile=v_tile,
            nlayers=nlayers, ff_buffers=1 if single_buffer_ff else 2)
        vmem_limit = int(min(max(budget, 32 << 20), 100 << 20))

        return pl.pallas_call(
            kernel,
            out_shape=jax.ShapeDtypeStruct((b_pad, 128), jnp.float32),
            grid_spec=pltpu.PrefetchScalarGridSpec(
                num_scalar_prefetch=0,
                grid=grid,
                in_specs=[pl.BlockSpec((b_tile, d_in_p), lambda b, v: (b, 0)),
                          pl.BlockSpec((b_tile, 1), lambda b, v: (b, 0))] + specs,
                out_specs=pl.BlockSpec((b_tile, 128), lambda b, v: (b, 0)),
                scratch_shapes=[pltpu.VMEM((b_tile, wo_rows), jnp.bfloat16),  # hidden activations
                                pltpu.VMEM((b_tile, 1), jnp.float32),         # running max m
                                pltpu.VMEM((b_tile, 1), jnp.float32),         # running sum l
                                pltpu.VMEM((b_tile, 1), jnp.float32)]),       # target logit
            compiler_params=pltpu.CompilerParams(
                dimension_semantics=("parallel", "arbitrary"),
                vmem_limit_bytes=vmem_limit),
        )(x_p, y_p, *flat)

    try:
        per_ex = run(single_buffer_ff=(nlayers > 0))
    except Exception:
        # pipeline_mode=pl.Buffered(1) not supported on this JAX build -> default double-buffering.
        per_ex = run(single_buffer_ff=False)

    losses = per_ex[:B, 0]                       # drop padded batch rows
    total = jnp.sum(losses)
    return total / B if mean else total


# ----------------------------------------------------------------------------- init / reference


def init_fflm_params(key, V, wdim, hdim, nhis, nlayers, init=0.1):
    """Deterministic uniform(-init, init) init, mirroring get_init_weights."""
    keys = jax.random.split(key, 2 * nlayers + 3)
    E = jax.random.uniform(keys[0], (V, wdim), jnp.float32, -init, init)
    ff = []
    d_in = nhis * wdim
    for l in range(nlayers):
        w = jax.random.uniform(keys[1 + 2 * l],
                               (d_in if l == 0 else hdim, hdim),
                               jnp.float32, -init, init)
        b = jax.random.uniform(keys[2 + 2 * l], (hdim,), jnp.float32, -init, init)
        ff.append((w, b))
    wo_in = d_in if nlayers < 1 else hdim
    wo = jax.random.uniform(keys[-2], (wo_in, V), jnp.float32, -init, init)
    bo = jax.random.uniform(keys[-1], (V,), jnp.float32, -init, init)
    return {"E": E, "ff": ff, "out": (wo, bo)}


def reference_forward(X, Y, params, *, nhis, wdim, mean=True):
    """Pure-JAX reference with the same bf16-matmul / f32-accumulate numerics."""
    B = X.shape[0]
    x = jnp.take(params["E"], X, axis=0).reshape(B, nhis * wdim).astype(jnp.bfloat16)
    for w, b in params["ff"]:
        h = jnp.dot(x, w.astype(jnp.bfloat16), preferred_element_type=jnp.float32) + b
        x = jax.nn.relu(h).astype(jnp.bfloat16)
    wo, bo = params["out"]
    logits = jnp.dot(x, wo.astype(jnp.bfloat16), preferred_element_type=jnp.float32) + bo
    logp = jax.nn.log_softmax(logits, axis=-1)
    nll = -jnp.take_along_axis(logp, Y.reshape(-1, 1), axis=1)[:, 0]
    return jnp.mean(nll) if mean else jnp.sum(nll)


if __name__ == "__main__":
    # --- test 1: toy shapes, single grid tile each way; params padded/cast once and reused ---
    V, wdim, hdim, nhis, nlayers, B = 50, 16, 32, 4, 1, 8
    key = jax.random.PRNGKey(0)
    kp, kx, ky = jax.random.split(key, 3)
    params = init_fflm_params(kp, V, wdim, hdim, nhis, nlayers, init=0.1)
    X = jax.random.randint(kx, (B, nhis), 0, V, dtype=jnp.int32)   # token histories
    Y = jax.random.randint(ky, (B,), 0, V, dtype=jnp.int32)        # next-token targets

    prepared = prepare_fflm_params(params, nhis=nhis, wdim=wdim)   # pad/cast once, not per call
    loss = jax.block_until_ready(fflm_forward(X, Y, prepared, nhis=nhis, wdim=wdim, mean=True))
    ref = reference_forward(X, Y, params, nhis=nhis, wdim=wdim, mean=True)
    assert abs(float(loss) - float(ref)) < 2e-3, (float(loss), float(ref))

    loss_sum = jax.block_until_ready(
        fflm_forward(X, Y, prepared, nhis=nhis, wdim=wdim, mean=False))
    ref_sum = reference_forward(X, Y, params, nhis=nhis, wdim=wdim, mean=False)
    assert abs(float(loss_sum) - float(ref_sum)) < 2e-2, (float(loss_sum), float(ref_sum))

    # --- test 2: multiple batch tiles, multiple V tiles, batch padding, 2 FF layers ---
    V2, wdim2, hdim2, nhis2, nlayers2, B2 = 300, 24, 64, 3, 2, 40
    kp2, kx2, ky2 = jax.random.split(jax.random.PRNGKey(1), 3)
    params2 = init_fflm_params(kp2, V2, wdim2, hdim2, nhis2, nlayers2, init=0.1)
    X2 = jax.random.randint(kx2, (B2, nhis2), 0, V2, dtype=jnp.int32)
    Y2 = jax.random.randint(ky2, (B2,), 0, V2, dtype=jnp.int32)

    loss2 = jax.block_until_ready(
        fflm_forward(X2, Y2, params2, nhis=nhis2, wdim=wdim2, mean=True,
                     block_b=16, block_v=128))
    ref2 = reference_forward(X2, Y2, params2, nhis=nhis2, wdim=wdim2, mean=True)
    assert abs(float(loss2) - float(ref2)) < 2e-3, (float(loss2), float(ref2))

    loss2_sum = jax.block_until_ready(
        fflm_forward(X2, Y2, params2, nhis=nhis2, wdim=wdim2, mean=False,
                     block_b=16, block_v=128))
    ref2_sum = reference_forward(X2, Y2, params2, nhis=nhis2, wdim=wdim2, mean=False)
    assert abs(float(loss2_sum) - float(ref2_sum)) < 5e-2, (float(loss2_sum), float(ref2_sum))

    print("KERNEL_OK")
</pallas_src>

<mosaic_0001>
module attributes {stable_mosaic.version = 11 : i64} {
  func.func @_fflm_kernel(%arg0: i32, %arg1: i32, %arg2: memref<16x256xbf16, #tpu.memory_space<vmem>>, %arg3: memref<16x1xi32, #tpu.memory_space<vmem>>, %arg4: memref<256x256xbf16, #tpu.memory_space<vmem>>, %arg5: memref<1x256xf32, #tpu.memory_space<vmem>>, %arg6: memref<256x128xbf16, #tpu.memory_space<vmem>>, %arg7: memref<1x128xf32, #tpu.memory_space<vmem>>, %arg8: memref<16x128xf32, #tpu.memory_space<vmem>>, %arg9: memref<16x256xbf16, #tpu.memory_space<vmem>>, %arg10: memref<16x1xf32, #tpu.memory_space<vmem>>, %arg11: memref<16x1xf32, #tpu.memory_space<vmem>>, %arg12: memref<16x1xf32, #tpu.memory_space<vmem>>) attributes {dimension_semantics = [#tpu.dimension_semantics<parallel>, #tpu.dimension_semantics<arbitrary>], iteration_bounds = array<i64: 1, 1>, scalar_prefetch = 0 : i64, scratch_operands = 4 : i64, tpu.core_type = #tpu.core_type<tc>, window_params = [{transform_indices = @transform_0, window_bounds = array<i64: 16, 256>}, {transform_indices = @transform_1, window_bounds = array<i64: 16, 1>}, {pipeline_mode = #tpu.pipeline_mode<synchronous>, transform_indices = @transform_2, window_bounds = array<i64: 256, 256>}, {pipeline_mode = #tpu.pipeline_mode<synchronous>, transform_indices = @transform_3, window_bounds = array<i64: 1, 256>}, {transform_indices = @transform_4, window_bounds = array<i64: 256, 128>}, {transform_indices = @transform_5, window_bounds = array<i64: 1, 128>}, {transform_indices = @transform_6, window_bounds = array<i64: 16, 128>}]} {
    %c0_i32 = arith.constant 0 : i32
    %0 = arith.cmpi eq, %arg1, %c0_i32 : i32
    %1 = arith.extui %0 : i1 to i32
    %c0_i32_0 = arith.constant 0 : i32
    %2 = arith.cmpi ne, %1, %c0_i32_0 : i32
    scf.if %2 {
      %c0_26 = arith.constant 0 : index
      %c0_27 = arith.constant 0 : index
      %43 = vector.load %arg2[%c0_26, %c0_27] : memref<16x256xbf16, #tpu.memory_space<vmem>>, vector<16x256xbf16>
      %c0_28 = arith.constant 0 : index
      %c0_29 = arith.constant 0 : index
      %44 = vector.load %arg4[%c0_28, %c0_29] : memref<256x256xbf16, #tpu.memory_space<vmem>>, vector<256x256xbf16>
      %c0_30 = arith.constant 0 : index
      %c0_31 = arith.constant 0 : index
      %45 = vector.load %arg5[%c0_30, %c0_31] : memref<1x256xf32, #tpu.memory_space<vmem>>, vector<1x256xf32>
      %cst_32 = arith.constant dense<0.000000e+00> : vector<16x256xf32>
      %46 = tpu.matmul %43, %44, %cst_32 {dimension_numbers = #tpu.dot_dimension_numbers<[1], [0], [0], [1], [0, 0, 1, 1], [], []>} : vector<16x256xbf16>, vector<256x256xbf16>, vector<16x256xf32> -> vector<16x256xf32>
      %47 = vector.broadcast %45 : vector<1x256xf32> to vector<16x256xf32>
      %48 = arith.addf %46, %47 : vector<16x256xf32>
      %cst_33 = arith.constant 0.000000e+00 : f32
      %49 = vector.broadcast %cst_33 : f32 to vector<16x256xf32>
      %50 = arith.maximumf %48, %49 : vector<16x256xf32>
      %51 = arith.truncf %50 : vector<16x256xf32> to vector<16x256xbf16>
      %c0_34 = arith.constant 0 : index
      %c0_35 = arith.constant 0 : index
      %52 = vector.load %arg9[%c0_34, %c0_35] : memref<16x256xbf16, #tpu.memory_space<vmem>>, vector<16x256xbf16>
      tpu.vector_store %arg9[%c0_34, %c0_35], %51 {strides = array<i32>} : memref<16x256xbf16, #tpu.memory_space<vmem>>, vector<16x256xbf16>,
      %cst_36 = arith.constant -1.000000e+30 : f32
      %53 = vector.broadcast %cst_36 : f32 to vector<16x1xf32>
      %c0_37 = arith.constant 0 : index
      %c0_38 = arith.constant 0 : index
      %54 = vector.load %arg10[%c0_37, %c0_38] : memref<16x1xf32, #tpu.memory_space<vmem>>, vector<16x1xf32>
      tpu.vector_store %arg10[%c0_37, %c0_38], %53 {strides = array<i32>} : memref<16x1xf32, #tpu.memory_space<vmem>>, vector<16x1xf32>,
      %cst_39 = arith.constant 0.000000e+00 : f32
      %55 = vector.broadcast %cst_39 : f32 to vector<16x1xf32>
      %c0_40 = arith.constant 0 : index
      %c0_41 = arith.constant 0 : index
      %56 = vector.load %arg11[%c0_40, %c0_41] : memref<16x1xf32, #tpu.memory_space<vmem>>, vector<16x1xf32>
      tpu.vector_store %arg11[%c0_40, %c0_41], %55 {strides = array<i32>} : memref<16x1xf32, #tpu.memory_space<vmem>>, vector<16x1xf32>,
      %cst_42 = arith.constant 0.000000e+00 : f32
      %57 = vector.broadcast %cst_42 : f32 to vector<16x1xf32>
      %c0_43 = arith.constant 0 : index
      %c0_44 = arith.constant 0 : index
      %58 = vector.load %arg12[%c0_43, %c0_44] : memref<16x1xf32, #tpu.memory_space<vmem>>, vector<16x1xf32>
      tpu.vector_store %arg12[%c0_43, %c0_44], %57 {strides = array<i32>} : memref<16x1xf32, #tpu.memory_space<vmem>>, vector<16x1xf32>,
    } else {
    }
    %c0 = arith.constant 0 : index
    %c0_1 = arith.constant 0 : index
    %3 = vector.load %arg6[%c0, %c0_1] : memref<256x128xbf16, #tpu.memory_space<vmem>>, vector<256x128xbf16>
    %c0_2 = arith.constant 0 : index
    %c0_3 = arith.constant 0 : index
    %4 = vector.load %arg7[%c0_2, %c0_3] : memref<1x128xf32, #tpu.memory_space<vmem>>, vector<1x128xf32>
    %c0_4 = arith.constant 0 : index
    %c0_5 = arith.constant 0 : index
    %5 = vector.load %arg9[%c0_4, %c0_5] : memref<16x256xbf16, #tpu.memory_space<vmem>>, vector<16x256xbf16>
    %cst = arith.constant dense<0.000000e+00> : vector<16x128xf32>
    %6 = tpu.matmul %5, %3, %cst {dimension_numbers = #tpu.dot_dimension_numbers<[1], [0], [0], [1], [0, 0, 1, 1], [], []>} : vector<16x256xbf16>, vector<256x128xbf16>, vector<16x128xf32> -> vector<16x128xf32>
    %7 = vector.broadcast %4 : vector<1x128xf32> to vector<16x128xf32>
    %8 = arith.addf %6, %7 : vector<16x128xf32>
    %c0_6 = arith.constant 0 : index
    %c0_7 = arith.constant 0 : index
    %9 = vector.load %arg10[%c0_6, %c0_7] : memref<16x1xf32, #tpu.memory_space<vmem>>, vector<16x1xf32>
    %cst_8 = arith.constant dense<0xFF800000> : vector<16xf32>
    %10 = vector.multi_reduction <maximumf>, %8, %cst_8 [1] : vector<16x128xf32> to vector<16xf32>
    %11 = vector.shape_cast %10 : vector<16xf32> to vector<16x1xf32>
    %12 = arith.maximumf %9, %11 : vector<16x1xf32>
    %13 = arith.subf %9, %12 : vector<16x1xf32>
    %14 = math.exp %13 : vector<16x1xf32>
    %15 = vector.broadcast %12 : vector<16x1xf32> to vector<16x128xf32>
    %16 = arith.subf %8, %15 : vector<16x128xf32>
    %17 = math.exp %16 : vector<16x128xf32>
    %c0_9 = arith.constant 0 : index
    %c0_10 = arith.constant 0 : index
    %18 = vector.load %arg11[%c0_9, %c0_10] : memref<16x1xf32, #tpu.memory_space<vmem>>, vector<16x1xf32>
    %19 = arith.mulf %14, %18 : vector<16x1xf32>
    %cst_11 = arith.constant dense<0.000000e+00> : vector<16xf32>
    %20 = vector.multi_reduction <add>, %17, %cst_11 [1] : vector<16x128xf32> to vector<16xf32>
    %21 = vector.shape_cast %20 : vector<16xf32> to vector<16x1xf32>
    %22 = arith.addf %19, %21 : vector<16x1xf32>
    %c0_12 = arith.constant 0 : index
    %c0_13 = arith.constant 0 : index
    %23 = vector.load %arg11[%c0_12, %c0_13] : memref<16x1xf32, #tpu.memory_space<vmem>>, vector<16x1xf32>
    tpu.vector_store %arg11[%c0_12, %c0_13], %22 {strides = array<i32>} : memref<16x1xf32, #tpu.memory_space<vmem>>, vector<16x1xf32>,
    %c0_14 = arith.constant 0 : index
    %c0_15 = arith.constant 0 : index
    %24 = vector.load %arg10[%c0_14, %c0_15] : memref<16x1xf32, #tpu.memory_space<vmem>>, vector<16x1xf32>
    tpu.vector_store %arg10[%c0_14, %c0_15], %12 {strides = array<i32>} : memref<16x1xf32, #tpu.memory_space<vmem>>, vector<16x1xf32>,
    %25 = tpu.iota {dimensions = array<i32: 1>} : vector<1x128xi32>
    %c0_16 = arith.constant 0 : index
    %c0_17 = arith.constant 0 : index
    %26 = vector.load %arg3[%c0_16, %c0_17] : memref<16x1xi32, #tpu.memory_space<vmem>>, vector<16x1xi32>
    %c128_i32 = arith.constant 128 : i32
    %27 = arith.muli %arg1, %c128_i32 : i32
    %28 = vector.broadcast %27 : i32 to vector<16x1xi32>
    %29 = arith.subi %26, %28 : vector<16x1xi32>
    %c0_18 = arith.constant 0 : index
    %c0_19 = arith.constant 0 : index
    %30 = vector.load %arg12[%c0_18, %c0_19] : memref<16x1xf32, #tpu.memory_space<vmem>>, vector<16x1xf32>
    %31 = vector.broadcast %25 : vector<1x128xi32> to vector<16x128xi32>
    %32 = vector.broadcast %29 : vector<16x1xi32> to vector<16x128xi32>
    %33 = arith.cmpi eq, %31, %32 : vector<16x128xi32>
    %cst_20 = arith.constant 0.000000e+00 : f32
    %34 = vector.broadcast %cst_20 : f32 to vector<16x128xf32>
    %35 = arith.select %33, %8, %34 : vector<16x128xi1>, vector<16x128xf32>
    %cst_21 = arith.constant dense<0.000000e+00> : vector<16xf32>
    %36 = vector.multi_reduction <add>, %35, %cst_21 [1] : vector<16x128xf32> to vector<16xf32>
    %37 = vector.shape_cast %36 : vector<16xf32> to vector<16x1xf32>
    %38 = arith.addf %30, %37 : vector<16x1xf32>
    %c0_22 = arith.constant 0 : index
    %c0_23 = arith.constant 0 : index
    %39 = vector.load %arg12[%c0_22, %c0_23] : memref<16x1xf32, #tpu.memory_space<vmem>>, vector<16x1xf32>
    tpu.vector_store %arg12[%c0_22, %c0_23], %38 {strides = array<i32>} : memref<16x1xf32, #tpu.memory_space<vmem>>, vector<16x1xf32>,
    %c0_i32_24 = arith.constant 0 : i32
    %40 = arith.cmpi eq, %arg1, %c0_i32_24 : i32
    %41 = arith.extui %40 : i1 to i32
    %c0_i32_25 = arith.constant 0 : i32
    %42 = arith.cmpi ne, %41, %c0_i32_25 : i32
    scf.if %42 {
      %c0_26 = arith.constant 0 : index
      %c0_27 = arith.constant 0 : index
      %43 = vector.load %arg10[%c0_26, %c0_27] : memref<16x1xf32, #tpu.memory_space<vmem>>, vector<16x1xf32>
      %c0_28 = arith.constant 0 : index
      %c0_29 = arith.constant 0 : index
      %44 = vector.load %arg11[%c0_28, %c0_29] : memref<16x1xf32, #tpu.memory_space<vmem>>, vector<16x1xf32>
      %45 = math.log %44 : vector<16x1xf32>
      %46 = arith.addf %43, %45 : vector<16x1xf32>
      %c0_30 = arith.constant 0 : index
      %c0_31 = arith.constant 0 : index
      %47 = vector.load %arg12[%c0_30, %c0_31] : memref<16x1xf32, #tpu.memory_space<vmem>>, vector<16x1xf32>
      %48 = arith.subf %46, %47 : vector<16x1xf32>
      %49 = vector.shape_cast %48 : vector<16x1xf32> to vector<16x1xf32>
      %50 = vector.broadcast %49 : vector<16x1xf32> to vector<16x128xf32>
      %c0_32 = arith.constant 0 : index
      %c0_33 = arith.constant 0 : index
      %51 = vector.load %arg8[%c0_32, %c0_33] : memref<16x128xf32, #tpu.memory_space<vmem>>, vector<16x128xf32>
      tpu.vector_store %arg8[%c0_32, %c0_33], %50 {strides = array<i32>} : memref<16x128xf32, #tpu.memory_space<vmem>>, vector<16x128xf32>,
    } else {
    }
    return
  }
  func.func @transform_0(%arg0: i32, %arg1: i32) -> (i32, i32) {
    %c0_i32 = arith.constant 0 : i32
    %c0_i32_0 = arith.constant 0 : i32
    return %arg0, %c0_i32 : i32, i32
  }
  func.func @transform_1(%arg0: i32, %arg1: i32) -> (i32, i32) {
    %c0_i32 = arith.constant 0 : i32
    %c0_i32_0 = arith.constant 0 : i32
    return %arg0, %c0_i32 : i32, i32
  }
  func.func @transform_2(%arg0: i32, %arg1: i32) -> (i32, i32) {
    %c0_i32 = arith.constant 0 : i32
    %c0_i32_0 = arith.constant 0 : i32
    %c0_i32_1 = arith.constant 0 : i32
    return %c0_i32, %c0_i32_0 : i32, i32
  }
  func.func @transform_3(%arg0: i32, %arg1: i32) -> (i32, i32) {
    %c0_i32 = arith.constant 0 : i32
    %c0_i32_0 = arith.constant 0 : i32
    %c0_i32_1 = arith.constant 0 : i32
    return %c0_i32, %c0_i32_0 : i32, i32
  }
  func.func @transform_4(%arg0: i32, %arg1: i32) -> (i32, i32) {
    %c0_i32 = arith.constant 0 : i32
    %c0_i32_0 = arith.constant 0 : i32
    return %c0_i32, %arg1 : i32, i32
  }
  func.func @transform_5(%arg0: i32, %arg1: i32) -> (i32, i32) {
    %c0_i32 = arith.constant 0 : i32
    %c0_i32_0 = arith.constant 0 : i32
    return %c0_i32, %arg1 : i32, i32
  }
  func.func @transform_6(%arg0: i32, %arg1: i32) -> (i32, i32) {
    %c0_i32 = arith.constant 0 : i32
    %c0_i32_0 = arith.constant 0 : i32
    return %arg0, %c0_i32 : i32, i32
  }
}

module attributes {stable_mosaic.version = 11 : i64} {
  func.func @_fflm_kernel(%arg0: i32, %arg1: i32, %arg2: memref<16x256xbf16, #tpu.memory_space<vmem>>, %arg3: memref<16x1xi32, #tpu.memory_space<vmem>>, %arg4: memref<256x256xbf16, #tpu.memory_space<vmem>>, %arg5: memref<1x256xf32, #tpu.memory_space<vmem>>, %arg6: memref<256x128xbf16, #tpu.memory_space<vmem>>, %arg7: memref<1x128xf32, #tpu.memory_space<vmem>>, %arg8: memref<16x128xf32, #tpu.memory_space<vmem>>, %arg9: memref<16x256xbf16, #tpu.memory_space<vmem>>, %arg10: memref<16x1xf32, #tpu.memory_space<vmem>>, %arg11: memref<16x1xf32, #tpu.memory_space<vmem>>, %arg12: memref<16x1xf32, #tpu.memory_space<vmem>>) attributes {dimension_semantics = [#tpu.dimension_semantics<parallel>, #tpu.dimension_semantics<arbitrary>], iteration_bounds = array<i64: 1, 1>, scalar_prefetch = 0 : i64, scratch_operands = 4 : i64, tpu.core_type = #tpu.core_type<tc>, window_params = [{transform_indices = @transform_0, window_bounds = array<i64: 16, 256>}, {transform_indices = @transform_1, window_bounds = array<i64: 16, 1>}, {pipeline_mode = #tpu.pipeline_mode<synchronous>, transform_indices = @transform_2, window_bounds = array<i64: 256, 256>}, {pipeline_mode = #tpu.pipeline_mode<synchronous>, transform_indices = @transform_3, window_bounds = array<i64: 1, 256>}, {transform_indices = @transform_4, window_bounds = array<i64: 256, 128>}, {transform_indices = @transform_5, window_bounds = array<i64: 1, 128>}, {transform_indices = @transform_6, window_bounds = array<i64: 16, 128>}]} {
    %c0_i32 = arith.constant 0 : i32
    %0 = arith.cmpi eq, %arg1, %c0_i32 : i32
    %1 = arith.extui %0 : i1 to i32
    %c0_i32_0 = arith.constant 0 : i32
    %2 = arith.cmpi ne, %1, %c0_i32_0 : i32
    scf.if %2 {
      %c0_26 = arith.constant 0 : index
      %c0_27 = arith.constant 0 : index
      %43 = vector.load %arg2[%c0_26, %c0_27] : memref<16x256xbf16, #tpu.memory_space<vmem>>, vector<16x256xbf16>
      %c0_28 = arith.constant 0 : index
      %c0_29 = arith.constant 0 : index
      %44 = vector.load %arg4[%c0_28, %c0_29] : memref<256x256xbf16, #tpu.memory_space<vmem>>, vector<256x256xbf16>
      %c0_30 = arith.constant 0 : index
      %c0_31 = arith.constant 0 : index
      %45 = vector.load %arg5[%c0_30, %c0_31] : memref<1x256xf32, #tpu.memory_space<vmem>>, vector<1x256xf32>
      %cst_32 = arith.constant dense<0.000000e+00> : vector<16x256xf32>
      %46 = tpu.matmul %43, %44, %cst_32 {dimension_numbers = #tpu.dot_dimension_numbers<[1], [0], [0], [1], [0, 0, 1, 1], [], []>} : vector<16x256xbf16>, vector<256x256xbf16>, vector<16x256xf32> -> vector<16x256xf32>
      %47 = vector.broadcast %45 : vector<1x256xf32> to vector<16x256xf32>
      %48 = arith.addf %46, %47 : vector<16x256xf32>
      %cst_33 = arith.constant 0.000000e+00 : f32
      %49 = vector.broadcast %cst_33 : f32 to vector<16x256xf32>
      %50 = arith.maximumf %48, %49 : vector<16x256xf32>
      %51 = arith.truncf %50 : vector<16x256xf32> to vector<16x256xbf16>
      %c0_34 = arith.constant 0 : index
      %c0_35 = arith.constant 0 : index
      %52 = vector.load %arg9[%c0_34, %c0_35] : memref<16x256xbf16, #tpu.memory_space<vmem>>, vector<16x256xbf16>
      tpu.vector_store %arg9[%c0_34, %c0_35], %51 {strides = array<i32>} : memref<16x256xbf16, #tpu.memory_space<vmem>>, vector<16x256xbf16>,
      %cst_36 = arith.constant -1.000000e+30 : f32
      %53 = vector.broadcast %cst_36 : f32 to vector<16x1xf32>
      %c0_37 = arith.constant 0 : index
      %c0_38 = arith.constant 0 : index
      %54 = vector.load %arg10[%c0_37, %c0_38] : memref<16x1xf32, #tpu.memory_space<vmem>>, vector<16x1xf32>
      tpu.vector_store %arg10[%c0_37, %c0_38], %53 {strides = array<i32>} : memref<16x1xf32, #tpu.memory_space<vmem>>, vector<16x1xf32>,
      %cst_39 = arith.constant 0.000000e+00 : f32
      %55 = vector.broadcast %cst_39 : f32 to vector<16x1xf32>
      %c0_40 = arith.constant 0 : index
      %c0_41 = arith.constant 0 : index
      %56 = vector.load %arg11[%c0_40, %c0_41] : memref<16x1xf32, #tpu.memory_space<vmem>>, vector<16x1xf32>
      tpu.vector_store %arg11[%c0_40, %c0_41], %55 {strides = array<i32>} : memref<16x1xf32, #tpu.memory_space<vmem>>, vector<16x1xf32>,
      %cst_42 = arith.constant 0.000000e+00 : f32
      %57 = vector.broadcast %cst_42 : f32 to vector<16x1xf32>
      %c0_43 = arith.constant 0 : index
      %c0_44 = arith.constant 0 : index
      %58 = vector.load %arg12[%c0_43, %c0_44] : memref<16x1xf32, #tpu.memory_space<vmem>>, vector<16x1xf32>
      tpu.vector_store %arg12[%c0_43, %c0_44], %57 {strides = array<i32>} : memref<16x1xf32, #tpu.memory_space<vmem>>, vector<16x1xf32>,
    } else {
    }
    %c0 = arith.constant 0 : index
    %c0_1 = arith.constant 0 : index
    %3 = vector.load %arg6[%c0, %c0_1] : memref<256x128xbf16, #tpu.memory_space<vmem>>, vector<256x128xbf16>
    %c0_2 = arith.constant 0 : index
    %c0_3 = arith.constant 0 : index
    %4 = vector.load %arg7[%c0_2, %c0_3] : memref<1x128xf32, #tpu.memory_space<vmem>>, vector<1x128xf32>
    %c0_4 = arith.constant 0 : index
    %c0_5 = arith.constant 0 : index
    %5 = vector.load %arg9[%c0_4, %c0_5] : memref<16x256xbf16, #tpu.memory_space<vmem>>, vector<16x256xbf16>
    %cst = arith.constant dense<0.000000e+00> : vector<16x128xf32>
    %6 = tpu.matmul %5, %3, %cst {dimension_numbers = #tpu.dot_dimension_numbers<[1], [0], [0], [1], [0, 0, 1, 1], [], []>} : vector<16x256xbf16>, vector<256x128xbf16>, vector<16x128xf32> -> vector<16x128xf32>
    %7 = vector.broadcast %4 : vector<1x128xf32> to vector<16x128xf32>
    %8 = arith.addf %6, %7 : vector<16x128xf32>
    %c0_6 = arith.constant 0 : index
    %c0_7 = arith.constant 0 : index
    %9 = vector.load %arg10[%c0_6, %c0_7] : memref<16x1xf32, #tpu.memory_space<vmem>>, vector<16x1xf32>
    %cst_8 = arith.constant dense<0xFF800000> : vector<16xf32>
    %10 = vector.multi_reduction <maximumf>, %8, %cst_8 [1] : vector<16x128xf32> to vector<16xf32>
    %11 = vector.shape_cast %10 : vector<16xf32> to vector<16x1xf32>
    %12 = arith.maximumf %9, %11 : vector<16x1xf32>
    %13 = arith.subf %9, %12 : vector<16x1xf32>
    %14 = math.exp %13 : vector<16x1xf32>
    %15 = vector.broadcast %12 : vector<16x1xf32> to vector<16x128xf32>
    %16 = arith.subf %8, %15 : vector<16x128xf32>
    %17 = math.exp %16 : vector<16x128xf32>
    %c0_9 = arith.constant 0 : index
    %c0_10 = arith.constant 0 : index
    %18 = vector.load %arg11[%c0_9, %c0_10] : memref<16x1xf32, #tpu.memory_space<vmem>>, vector<16x1xf32>
    %19 = arith.mulf %14, %18 : vector<16x1xf32>
    %cst_11 = arith.constant dense<0.000000e+00> : vector<16xf32>
    %20 = vector.multi_reduction <add>, %17, %cst_11 [1] : vector<16x128xf32> to vector<16xf32>
    %21 = vector.shape_cast %20 : vector<16xf32> to vector<16x1xf32>
    %22 = arith.addf %19, %21 : vector<16x1xf32>
    %c0_12 = arith.constant 0 : index
    %c0_13 = arith.constant 0 : index
    %23 = vector.load %arg11[%c0_12, %c0_13] : memref<16x1xf32, #tpu.memory_space<vmem>>, vector<16x1xf32>
    tpu.vector_store %arg11[%c0_12, %c0_13], %22 {strides = array<i32>} : memref<16x1xf32, #tpu.memory_space<vmem>>, vector<16x1xf32>,
    %c0_14 = arith.constant 0 : index
    %c0_15 = arith.constant 0 : index
    %24 = vector.load %arg10[%c0_14, %c0_15] : memref<16x1xf32, #tpu.memory_space<vmem>>, vector<16x1xf32>
    tpu.vector_store %arg10[%c0_14, %c0_15], %12 {strides = array<i32>} : memref<16x1xf32, #tpu.memory_space<vmem>>, vector<16x1xf32>,
    %25 = tpu.iota {dimensions = array<i32: 1>} : vector<1x128xi32>
    %c0_16 = arith.constant 0 : index
    %c0_17 = arith.constant 0 : index
    %26 = vector.load %arg3[%c0_16, %c0_17] : memref<16x1xi32, #tpu.memory_space<vmem>>, vector<16x1xi32>
    %c128_i32 = arith.constant 128 : i32
    %27 = arith.muli %arg1, %c128_i32 : i32
    %28 = vector.broadcast %27 : i32 to vector<16x1xi32>
    %29 = arith.subi %26, %28 : vector<16x1xi32>
    %c0_18 = arith.constant 0 : index
    %c0_19 = arith.constant 0 : index
    %30 = vector.load %arg12[%c0_18, %c0_19] : memref<16x1xf32, #tpu.memory_space<vmem>>, vector<16x1xf32>
    %31 = vector.broadcast %25 : vector<1x128xi32> to vector<16x128xi32>
    %32 = vector.broadcast %29 : vector<16x1xi32> to vector<16x128xi32>
    %33 = arith.cmpi eq, %31, %32 : vector<16x128xi32>
    %cst_20 = arith.constant 0.000000e+00 : f32
    %34 = vector.broadcast %cst_20 : f32 to vector<16x128xf32>
    %35 = arith.select %33, %8, %34 : vector<16x128xi1>, vector<16x128xf32>
    %cst_21 = arith.constant dense<0.000000e+00> : vector<16xf32>
    %36 = vector.multi_reduction <add>, %35, %cst_21 [1] : vector<16x128xf32> to vector<16xf32>
    %37 = vector.shape_cast %36 : vector<16xf32> to vector<16x1xf32>
    %38 = arith.addf %30, %37 : vector<16x1xf32>
    %c0_22 = arith.constant 0 : index
    %c0_23 = arith.constant 0 : index
    %39 = vector.load %arg12[%c0_22, %c0_23] : memref<16x1xf32, #tpu.memory_space<vmem>>, vector<16x1xf32>
    tpu.vector_store %arg12[%c0_22, %c0_23], %38 {strides = array<i32>} : memref<16x1xf32, #tpu.memory_space<vmem>>, vector<16x1xf32>,
    %c0_i32_24 = arith.constant 0 : i32
    %40 = arith.cmpi eq, %arg1, %c0_i32_24 : i32
    %41 = arith.extui %40 : i1 to i32
    %c0_i32_25 = arith.constant 0 : i32
    %42 = arith.cmpi ne, %41, %c0_i32_25 : i32
    scf.if %42 {
      %c0_26 = arith.constant 0 : index
      %c0_27 = arith.constant 0 : index
      %43 = vector.load %arg10[%c0_26, %c0_27] : memref<16x1xf32, #tpu.memory_space<vmem>>, vector<16x1xf32>
      %c0_28 = arith.constant 0 : index
      %c0_29 = arith.constant 0 : index
      %44 = vector.load %arg11[%c0_28, %c0_29] : memref<16x1xf32, #tpu.memory_space<vmem>>, vector<16x1xf32>
      %45 = math.log %44 : vector<16x1xf32>
      %46 = arith.addf %43, %45 : vector<16x1xf32>
      %c0_30 = arith.constant 0 : index
      %c0_31 = arith.constant 0 : index
      %47 = vector.load %arg12[%c0_30, %c0_31] : memref<16x1xf32, #tpu.memory_space<vmem>>, vector<16x1xf32>
      %48 = arith.subf %46, %47 : vector<16x1xf32>
      %49 = vector.shape_cast %48 : vector<16x1xf32> to vector<16x1xf32>
      %50 = vector.broadcast %49 : vector<16x1xf32> to vector<16x128xf32>
      %c0_32 = arith.constant 0 : index
      %c0_33 = arith.constant 0 : index
      %51 = vector.load %arg8[%c0_32, %c0_33] : memref<16x128xf32, #tpu.memory_space<vmem>>, vector<16x128xf32>
      tpu.vector_store %arg8[%c0_32, %c0_33], %50 {strides = array<i32>} : memref<16x128xf32, #tpu.memory_space<vmem>>, vector<16x128xf32>,
    } else {
    }
    return
  }
  func.func @transform_0(%arg0: i32, %arg1: i32) -> (i32, i32) {
    %c0_i32 = arith.constant 0 : i32
    %c0_i32_0 = arith.constant 0 : i32
    return %arg0, %c0_i32 : i32, i32
  }
  func.func @transform_1(%arg0: i32, %arg1: i32) -> (i32, i32) {
    %c0_i32 = arith.constant 0 : i32
    %c0_i32_0 = arith.constant 0 : i32
    return %arg0, %c0_i32 : i32, i32
  }
  func.func @transform_2(%arg0: i32, %arg1: i32) -> (i32, i32) {
    %c0_i32 = arith.constant 0 : i32
    %c0_i32_0 = arith.constant 0 : i32
    %c0_i32_1 = arith.constant 0 : i32
    return %c0_i32, %c0_i32_0 : i32, i32
  }
  func.func @transform_3(%arg0: i32, %arg1: i32) -> (i32, i32) {
    %c0_i32 = arith.constant 0 : i32
    %c0_i32_0 = arith.constant 0 : i32
    %c0_i32_1 = arith.constant 0 : i32
    return %c0_i32, %c0_i32_0 : i32, i32
  }
  func.func @transform_4(%arg0: i32, %arg1: i32) -> (i32, i32) {
    %c0_i32 = arith.constant 0 : i32
    %c0_i32_0 = arith.constant 0 : i32
    return %c0_i32, %arg1 : i32, i32
  }
  func.func @transform_5(%arg0: i32, %arg1: i32) -> (i32, i32) {
    %c0_i32 = arith.constant 0 : i32
    %c0_i32_0 = arith.constant 0 : i32
    return %c0_i32, %arg1 : i32, i32
  }
  func.func @transform_6(%arg0: i32, %arg1: i32) -> (i32, i32) {
    %c0_i32 = arith.constant 0 : i32
    %c0_i32_0 = arith.constant 0 : i32
    return %arg0, %c0_i32 : i32, i32
  }
}

</mosaic_0001>

<bundles_post_ra>
// kernel: tpu_custom_call.1
= control target key start
LH: loop header
LB: loop body
LE: loop exit
PB: predicated region body
PF: predicated region fallthrough
CT: control target
= control target key end

     0   :  { %11 = vsyncpa [#allocation7], 0  ;;  %s982_s0 = inlined_call_operand.vmem [shape: bf16[16,256], index: 0, kind: input, shape index: {}]   ;;  %s983_s1 = inlined_call_operand.vmem [shape: s32[16,1], index: 1, kind: input, shape index: {}]   ;;  %s984_s2 = inlined_call_operand.hbm [shape: bf16[256,256], index: 2, kind: input, shape index: {}]   ;;  %s985_s3 = inlined_call_operand.vmem [shape: f32[1,256], index: 3, kind: input, shape index: {}]   ;;  %s986_s4 = inlined_call_operand.hbm [shape: bf16[256,128], index: 4, kind: input, shape index: {}]   ;;  %s987_s5 = inlined_call_operand.vmem [shape: f32[1,128], index: 5, kind: input, shape index: {}]   ;;  %s988_s6 = inlined_call_operand.hbm [shape: f32[16,128], index: 6, kind: output, shape index: {}]  }
   0x1   :  { %12 = vsyncpa [#allocation10], 0 }
   0x2   :  { %13 = vsyncpa [#allocation8], 0  ;;  %s865_s21 = smov [#allocation6]   ;;  %s793_s25 = scalar_lea.hbm %s984_s2, 4096 }
   0x3   :  { %s23_s22 = sshll.u32 %s865_s21, 4  ;;  %p794_p0 = scmp.ne.s32.totalorder %s984_s2, %s793_s25  ;;  %s24_s22 = int_to_ptr.vmem [resolvable:$true] %s23_s22 }
   0x4   :  { %p797_p1 = scmp.lt.u32.totalorder %s793_s25, %s984_s2 }
   0x6   :  { %p799_p2 = pnand %p797_p1, %p794_p0 }
   0x8   :  { %802 = shalt.err (!%p799_p2)
}
   0x9   :  { %s803_s30 = scalar_lea.vmem %s24_s22, 4096  ;;  %p808_p4 = scmp.lt.s32.totalorder %s24_s22, %s24_s22 }
   0xa   :  { %p804_p3 = scmp.ne.s32.totalorder %s24_s22, %s803_s30  ;;  %p809_p5 = scmp.lt.s32.totalorder %s803_s30, %s803_s30 }
   0xc   :  { %p810_p6 = por %p809_p5, %p808_p4 }
   0xe   :  { %p811_p7 = pnand %p810_p6, %p804_p3 }
  0x10   :  { %814 = shalt.err (!%p811_p7)
}
  0x11   :  { %s866_s7 = smov 128   ;;  %s867_s8 = smov 8  }
  0x12   :  { %29 = dma.hbm_to_vmem [thread:$0]  %s984_s2, 4096, %s24_s22, [#allocation7], %s866_s7, %s866_s7, %s867_s8  }
  0x13   :  { %s868_s11 = smov [#allocation9]   ;;  %s815_s15 = scalar_lea.hbm %s986_s4, 2048 }
  0x14   :  { %s37_s12 = sshll.u32 %s868_s11, 4  ;;  %p816_p8 = scmp.ne.s32.totalorder %s986_s4, %s815_s15  ;;  %s38_s12 = int_to_ptr.vmem [resolvable:$true] %s37_s12 }
  0x15   :  { %p819_p9 = scmp.lt.u32.totalorder %s815_s15, %s986_s4 }
  0x17   :  { %p821_p10 = pnand %p819_p9, %p816_p8 }
  0x19   :  { %824 = shalt.err (!%p821_p10)
}
  0x1a   :  { %s825_s20 = scalar_lea.vmem %s38_s12, 2048  ;;  %p830_p12 = scmp.lt.s32.totalorder %s38_s12, %s38_s12 }
  0x1b   :  { %p826_p11 = scmp.ne.s32.totalorder %s38_s12, %s825_s20  ;;  %p831_p13 = scmp.lt.s32.totalorder %s825_s20, %s825_s20 }
  0x1d   :  { %p832_p0 = por %p831_p13, %p830_p12 }
  0x1f   :  { %p833_p1 = pnand %p832_p0, %p826_p11 }
  0x21   :  { %836 = shalt.err (!%p833_p1)
}
  0x22   :  { %s869_s2 = smov 64   ;;  %s870_s21 = smov 4  }
  0x23   :  { %43 = dma.hbm_to_vmem [thread:$0]  %s986_s4, 2048, %s38_s12, [#allocation10], %s869_s2, %s869_s2, %s870_s21  }
  0x24   :  { %859 = dma.done.wait [#allocation7], 4096  }
  0x25   :  { %860 = vsyncadd [#allocation7], 4294963200 }
  0x26   :  { %861 = dma.done.wait [#allocation10], 2048  }
  0x27   :  { %862 = vsyncadd [#allocation10], 4294965248  ;;  %v714_v0 = vld [vmem:[#allocation6 + $0x4] ss:$8 sps:$4 sm:$0xff]   ;;  %v716_v1 = vld [vmem:[#allocation6] ss:$8 sps:$4 sm:$0xff]   ;;  %v93_v50 = vlaneseq }
  0x28   :  { %273 = vmatprep.subr.bf16.mxu0 %v714_v0  ;;  %v717_v2 = vld [vmem:[#allocation6 + $0x14] ss:$8 sps:$4 sm:$0xff]   ;;  %v719_v3 = vld [vmem:[#allocation6 + $0x10] ss:$8 sps:$4 sm:$0xff]   ;;  %v720_v4 = vld [vmem:[#allocation6 + $0x24] ss:$8 sps:$4 sm:$0xff]  }
  0x29   :  { %274 = vmatpush1.bf16.msra.mxu0 %v716_v1  ;;  %v722_v5 = vld [vmem:[#allocation6 + $0x20] ss:$8 sps:$4 sm:$0xff]   ;;  %v723_v6 = vld [vmem:[#allocation6 + $0x34] ss:$8 sps:$4 sm:$0xff]   ;;  %v725_v7 = vld [vmem:[#allocation6 + $0x30] ss:$8 sps:$4 sm:$0xff]  }
  0x2a   :  { %275 = vmatprep.subr.bf16.mxu0 %v717_v2  ;;  %v726_v8 = vld [vmem:[#allocation6 + $0x44] ss:$8 sps:$4 sm:$0xff]   ;;  %v728_v9 = vld [vmem:[#allocation6 + $0x40] ss:$8 sps:$4 sm:$0xff]   ;;  %v729_v10 = vld [vmem:[#allocation6 + $0x54] ss:$8 sps:$4 sm:$0xff]  }
  0x2b   :  { %v731_v11 = vld [vmem:[#allocation6 + $0x50] ss:$8 sps:$4 sm:$0xff]   ;;  %v732_v12 = vld [vmem:[#allocation6 + $0x64] ss:$8 sps:$4 sm:$0xff]   ;;  %v734_v13 = vld [vmem:[#allocation6 + $0x60] ss:$8 sps:$4 sm:$0xff]  }
  0x2c   :  { %v735_v14 = vld [vmem:[#allocation6 + $0x74] ss:$8 sps:$4 sm:$0xff]   ;;  %v765_v16 = vld [vmem:[#allocation9 + $0x40] sm:$0xff]   ;;  %v737_v18 = vld [vmem:[#allocation6 + $0x70] ss:$8 sps:$4 sm:$0xff]   ;;  %v94_v51 = vshrl.u32 %v93_v50, 7 }
  0x2d   :  { %276 = vmatpush1.bf16.msra.mxu0 %v719_v3  ;;  %v764_v15 = vld [vmem:[%s982_s0 + $0x4] ss:$8 sps:$4 sm:$0xff]   ;;  %v766_v17 = vld [vmem:[#allocation9] sm:$0xff]   ;;  %680 = vmatprep.subr.bf16.mxu1 %v765_v16  ;;  %v767_v19 = vld [vmem:[#allocation9 + $0x48] sm:$0xff]   ;;  %vm324_vm0 = vcmask 7168  }
  0x2e   :  { %277 = vmatprep.subr.bf16.mxu0 %v720_v4  ;;  %305 = vmatprep.mubr.bf16.mxu0 %v764_v15  ;;  %v768_v20 = vld [vmem:[#allocation9 + $0x8] sm:$0xff]   ;;  %v769_v21 = vld [vmem:[#allocation9 + $0x50] sm:$0xff]   ;;  %v771_v25 = vld [vmem:[#allocation9 + $0x58] sm:$0xff]   ;;  %v95_v52 = vsub.s32 0, %v94_v51  ;;  %v99_v54 = vsub.s32 1, %v94_v51 }
  0x2f   :  { %681 = vmatpush3.bf16.msra.mxu1 %v766_v17  ;;  %v738_v22 = vld [vmem:[#allocation6 + $0x84] ss:$8 sps:$4 sm:$0xff]   ;;  %v740_v23 = vld [vmem:[#allocation6 + $0x80] ss:$8 sps:$4 sm:$0xff]   ;;  %v770_v24 = vld [vmem:[#allocation9 + $0x10] sm:$0xff]  }
  0x30   :  { %682 = vmatprep.subr.bf16.mxu1 %v767_v19  ;;  %v741_v26 = vld [vmem:[#allocation6 + $0x94] ss:$8 sps:$4 sm:$0xff]   ;;  %v743_v27 = vld [vmem:[#allocation6 + $0x90] ss:$8 sps:$4 sm:$0xff]   ;;  %v773_v29 = vld [vmem:[#allocation9 + $0x60] sm:$0xff]   ;;  %v873_v19 = vmov 0.0  }
  0x31   :  { %278 = vmatpush1.bf16.msra.mxu0 %v722_v5  ;;  %v772_v28 = vld [vmem:[#allocation9 + $0x18] sm:$0xff]   ;;  %v744_v30 = vld [vmem:[#allocation6 + $0xa4] ss:$8 sps:$4 sm:$0xff]   ;;  %v746_v32 = vld [vmem:[#allocation6 + $0xa0] ss:$8 sps:$4 sm:$0xff]   ;;  %329 = vst.msk [vmem:[#allocation5] sm:$0xff] %vm324_vm0, %v873_v19 }
  0x32   :  { %279 = vmatprep.subr.bf16.mxu0 %v723_v6  ;;  %v774_v31 = vld [vmem:[#allocation9 + $0x20] sm:$0xff]   ;;  %v775_v33 = vld [vmem:[#allocation9 + $0x68] sm:$0xff]   ;;  %v747_v34 = vld [vmem:[#allocation6 + $0xb4] ss:$8 sps:$4 sm:$0xff]   ;;  %327 = vst.msk [vmem:[#allocation4] sm:$0xff] %vm324_vm0, %v873_v19 }
  0x33   :  { %683 = vmatpush3.bf16.msra.mxu1 %v768_v20  ;;  %v749_v35 = vld [vmem:[#allocation6 + $0xb0] ss:$8 sps:$4 sm:$0xff]   ;;  %v750_v36 = vld [vmem:[#allocation6 + $0xc4] ss:$8 sps:$4 sm:$0xff]   ;;  %v752_v37 = vld [vmem:[#allocation6 + $0xc0] ss:$8 sps:$4 sm:$0xff]  }
  0x34   :  { %684 = vmatprep.subr.bf16.mxu1 %v769_v21  ;;  %v753_v38 = vld [vmem:[#allocation6 + $0xd4] ss:$8 sps:$4 sm:$0xff]   ;;  %v755_v39 = vld [vmem:[#allocation6 + $0xd0] ss:$8 sps:$4 sm:$0xff]   ;;  %v756_v40 = vld [vmem:[#allocation6 + $0xe4] ss:$8 sps:$4 sm:$0xff]  }
  0x35   :  { %280 = vmatpush1.bf16.msra.mxu0 %v725_v7  ;;  %v758_v41 = vld [vmem:[#allocation6 + $0xe0] ss:$8 sps:$4 sm:$0xff]   ;;  %v759_v42 = vld [vmem:[#allocation6 + $0xf4] ss:$8 sps:$4 sm:$0xff]   ;;  %v761_v43 = vld [vmem:[#allocation6 + $0xf0] ss:$8 sps:$4 sm:$0xff]  }
  0x36   :  { %281 = vmatprep.subr.bf16.mxu0 %v726_v8  ;;  %v762_v44 = vld [vmem:[%s982_s0] ss:$8 sps:$4 sm:$0xff]   ;;  %v776_v45 = vld [vmem:[#allocation9 + $0x28] sm:$0xff]   ;;  %v871_v7 = vmov 0   ;;  %v872_v8 = vmov -1e+30  }
  0x37   :  { %685 = vmatpush3.bf16.msra.mxu1 %v770_v24  ;;  %v777_v46 = vld [vmem:[#allocation9 + $0x70] sm:$0xff]   ;;  %v779_v48 = vld [vmem:[#allocation9 + $0x78] sm:$0xff]   ;;  %713 = vset.pattern.permute.xlu0 %v871_v7  ;;  %325 = vst.msk [vmem:[#allocation3] sm:$0xff] %vm324_vm0, %v872_v8  ;;  %326 = vst.msk [vmem:[#allocation3 + $0x8] sm:$0xff] %vm324_vm0, %v872_v8 }
  0x38   :  { %686 = vmatprep.subr.bf16.mxu1 %v771_v25  ;;  %v778_v47 = vld [vmem:[#allocation9 + $0x30] sm:$0xff]   ;;  %v780_v49 = vld [vmem:[#allocation9 + $0x38] sm:$0xff]   ;;  %712 = vset.pattern.permute.xlu1 %v871_v7  ;;  %328 = vst.msk [vmem:[#allocation4 + $0x8] sm:$0xff] %vm324_vm0, %v873_v19  ;;  %330 = vst.msk [vmem:[#allocation5 + $0x8] sm:$0xff] %vm324_vm0, %v873_v19 }
  0x39   :  { %282 = vmatpush1.bf16.msra.mxu0 %v728_v9  ;;  %v91_v53 = vld [vmem:[%s985_s3] sm:$0x3] }
  0x3a   :  { %283 = vmatprep.subr.bf16.mxu0 %v729_v10  ;;  %v96_v55 = vrot.slane %v91_v53, %v95_v52  ;;  %v100_v56 = vrot.slane %v91_v53, %v99_v54  ;;  %v663_v10 = vld [vmem:[%s987_s5] ss:$0 sm:$0xff] }
  0x3b   :  { %687 = vmatpush3.bf16.msra.mxu1 %v772_v28  ;;  %v557_v28 = vld [vmem:[%s983_s1 + $0x8] sm:$0xff] }
  0x3c   :  { %688 = vmatprep.subr.bf16.mxu1 %v773_v29  ;;  %v555_v29 = vand.u32 127, %v93_v50 }
  0x3d   :  { %284 = vmatpush1.bf16.msra.mxu0 %v731_v11 }
  0x3e   :  { %285 = vmatprep.subr.bf16.mxu0 %v732_v12  ;;  %v509_v20 = vld [vmem:[#allocation3] sm:$0xff] }
  0x3f   :  { %689 = vmatpush3.bf16.msra.mxu1 %v774_v31  ;;  %v540_v52 = vld [vmem:[#allocation4 + $0x8] sm:$0xff] }
  0x40   :  { %690 = vmatprep.subr.bf16.mxu1 %v775_v33 }
  0x41   :  { %286 = vmatpush1.bf16.msra.mxu0 %v734_v13 }
  0x42   :  { %287 = vmatprep.subr.bf16.mxu0 %v735_v14 }
  0x43   :  { %691 = vmatpush3.bf16.msra.mxu1 %v776_v45 }
  0x44   :  { %692 = vmatprep.subr.bf16.mxu1 %v777_v46 }
  0x45   :  { %288 = vmatpush1.bf16.msra.mxu0 %v737_v18  ;;  %v556_v18 = vld [vmem:[%s983_s1] sm:$0xff]  ;;  %s874_s1 = smov [#allocation11]  }
  0x46   :  { %289 = vmatprep.subr.bf16.mxu0 %v738_v22  ;;  %s616_s10 = sshll.u32 %s874_s1, 4  ;;  %s617_s10 = int_to_ptr.vmem [resolvable:$true] %s616_s10 }
  0x47   :  { %693 = vmatpush3.bf16.msra.mxu1 %v778_v47  ;;  %s837_s11 = scalar_lea.vmem %s617_s10, 256  ;;  %p842_p3 = scmp.lt.s32.totalorder %s617_s10, %s617_s10 }
  0x48   :  { %694 = vmatprep.subr.bf16.mxu1 %v779_v48  ;;  %v539_v48 = vld [vmem:[#allocation4] sm:$0xff]  ;;  %p838_p2 = scmp.ne.s32.totalorder %s617_s10, %s837_s11  ;;  %p843_p4 = scmp.lt.s32.totalorder %s837_s11, %s837_s11 }
  0x49   :  { %290 = vmatpush1.bf16.msra.mxu0 %v740_v23  ;;  %v510_v23 = vld [vmem:[#allocation3 + $0x8] sm:$0xff] }
  0x4a   :  { %291 = vmatprep.subr.bf16.mxu0 %v741_v26  ;;  %p844_p5 = por %p843_p4, %p842_p3 }
  0x4b   :  { %695 = vmatpush3.bf16.msra.mxu1 %v780_v49 }
  0x4c   :  { %p845_p6 = pnand %p844_p5, %p838_p2 }
  0x4d   :  { %292 = vmatpush1.bf16.msra.mxu0 %v743_v27 }
  0x4e   :  { %293 = vmatprep.subr.bf16.mxu0 %v744_v30 }
  0x51   :  { %294 = vmatpush1.bf16.msra.mxu0 %v746_v32 }
  0x52   :  { %295 = vmatprep.subr.bf16.mxu0 %v747_v34 }
  0x55   :  { %296 = vmatpush1.bf16.msra.mxu0 %v749_v35 }
  0x56   :  { %297 = vmatprep.subr.bf16.mxu0 %v750_v36 }
  0x59   :  { %298 = vmatpush1.bf16.msra.mxu0 %v752_v37 }
  0x5a   :  { %299 = vmatprep.subr.bf16.mxu0 %v753_v38 }
  0x5d   :  { %300 = vmatpush1.bf16.msra.mxu0 %v755_v39 }
  0x5e   :  { %301 = vmatprep.subr.bf16.mxu0 %v756_v40 }
  0x61   :  { %302 = vmatpush1.bf16.msra.mxu0 %v758_v41 }
  0x62   :  { %303 = vmatprep.subr.bf16.mxu0 %v759_v42  ;;  %v562_v42 = vld [vmem:[#allocation5] sm:$0xff] }
  0x65   :  { %304 = vmatpush1.bf16.msra.mxu0 %v761_v43 }
  0x68   :  { %306 = vmatmul.mubr.bf16.vlgmr.msra.gmra.mrb[0].mxu0 %v762_v44 }
 0x13b   :  { %v307_v57 = vpop.f32.mrb[0].mxu0 }
 0x13c   :  { %v308_v58 = vadd.f32 %v307_v57, %v96_v55  ;;  %v309_v59 = vpop.f32.mrb[1].mxu0  ;;  %v563_v57 = vld [vmem:[#allocation5 + $0x8] sm:$0xff] }
 0x13d   :  { %v310_v60 = vadd.f32 %v309_v59, %v100_v56  ;;  %v311_v61 = vpop.f32.mrb[2].mxu0 }
 0x13e   :  { %v312_v62 = vadd.f32 %v311_v61, %v96_v55  ;;  %v313_v63 = vpop.f32.mrb[3].mxu0  ;;  %v316_v1 = vmax.f32 %v308_v58, 0.0 }
 0x13f   :  { %v314_v0 = vadd.f32 %v313_v63, %v100_v56  ;;  %v317_v3 = vmax.f32 %v310_v60, 0.0 }
 0x140   :  { %v318_v2 = vmax.f32 %v312_v62, 0.0 }
 0x141   :  { %v319_v4 = vmax.f32 %v314_v0, 0.0 }
 0x142   :  { %v320_v5 = vpack.c.bf16 %v318_v2, %v316_v1 }
 0x143   :  { %v321_v6 = vpack.c.bf16 %v319_v4, %v317_v3 }
 0x145   :  { %500 = vmatprep.mubr.bf16.mxu1 %v321_v6 }
 0x146   :  { %501 = vmatmul.mubr.bf16.vlgmr.msra.gmra.mrb[0].mxu1 %v320_v5 }
 0x219   :  { %v696_v9 = vpop.f32.mrb[0].mxu1 }
 0x21a   :  { %v697_v11 = vpop.f32.mrb[1].mxu1 }
 0x21b   :  { %v698_v12 = vadd.f32 %v697_v11, %v696_v9  ;;  %v699_v13 = vpop.f32.mrb[2].mxu1 }
 0x21c   :  { %v700_v14 = vpop.f32.mrb[3].mxu1 }
 0x21d   :  { %v503_v15 = vadd.f32 %v698_v12, %v663_v10  ;;  %v701_v16 = vadd.f32 %v700_v14, %v699_v13 }
 0x21f   :  { %511 = vmax.xlane.f32.xlu0 %v503_v15  ;;  %v506_v17 = vadd.f32 %v701_v16, %v663_v10 }
 0x223   :  { %513 = vmax.xlane.f32.xlu0 %v506_v17 }
 0x239   :  { %565 = vperm.xlu0 %713, %v556_v18  }
 0x2ac   :  { %v512_v21 = vpop.xlane.xlu0 %511 }
 0x2ad   :  { %v515_v22 = vmax.f32 %v509_v20, %v512_v21 }
 0x2af   :  { %v517_v24 = vsub.f32 %v509_v20, %v515_v22  ;;  %552 = vst.msk [vmem:[#allocation3] sm:$0xff] %vm324_vm0, %v515_v22  ;;  %525 = vperm.xlu1 %712, %v515_v22  }
 0x2b0   :  { %v514_v25 = vpop.xlane.xlu0 %513 }
 0x2b1   :  { %v516_v26 = vmax.f32 %v510_v23, %v514_v25  ;;  %v519_v45 = vmul.f32 1.442695, %v517_v24 }
 0x2b3   :  { %v518_v27 = vsub.f32 %v510_v23, %v516_v26  ;;  %553 = vst.msk [vmem:[#allocation3 + $0x8] sm:$0xff] %vm324_vm0, %v516_v26  ;;  %530 = vperm.xlu1 %712, %v516_v26  }
 0x2b5   :  { %v521_v46 = vmul.f32 1.442695, %v518_v27 }
 0x2b6   :  { %v585_v0 = vld [vmem:[#allocation3] sm:$0xff] }
 0x2b7   :  { %568 = vperm.xlu1 %712, %v557_v28  }
 0x2b8   :  { %v566_v30 = vpop.permute.xlu0 %565 }
 0x2b9   :  { %vm570_vm1 = vcmp.eq.s32.totalorder %v555_v29, %v566_v30 }
 0x2ba   :  { %v572_v31 = vsel %vm570_vm1, %v503_v15, 0.0  ;;  %v586_v6 = vld [vmem:[#allocation3 + $0x8] sm:$0xff] }
 0x2bb   :  { %574 = vadd.xlane.f32.xlu0 %v572_v31 }
 0x32e   :  { %v526_v32 = vpop.permute.xlu1 %525 }
 0x32f   :  { %v533_v33 = vsub.f32 %v503_v15, %v526_v32 }
 0x331   :  { %v535_v34 = vmul.f32 1.442695, %v533_v33 }
 0x332   :  { %v531_v35 = vpop.permute.xlu1 %530 }
 0x333   :  { %781 = vpow2.f32 %v535_v34  ;;  %v534_v36 = vsub.f32 %v506_v17, %v531_v35 }
 0x335   :  { %v537_v37 = vmul.f32 1.442695, %v534_v36 }
 0x336   :  { %v569_v39 = vpop.permute.xlu1 %568 }
 0x337   :  { %783 = vpow2.f32 %v537_v37  ;;  %vm571_vm2 = vcmp.eq.s32.totalorder %v555_v29, %v569_v39 }
 0x338   :  { %v573_v41 = vsel %vm571_vm2, %v506_v17, 0.0  ;;  %785 = vpow2.f32 %v519_v45 }
 0x339   :  { %787 = vpow2.f32 %v521_v46 }
 0x33d   :  { %v782_v38 = vpop.eup %781 }
 0x33e   :  { %543 = vadd.xlane.f32.xlu1 %v782_v38 }
 0x341   :  { %v784_v40 = vpop.eup %783 }
 0x342   :  { %545 = vadd.xlane.f32.xlu1 %v784_v40  ;;  %v786_v47 = vpop.eup %785 }
 0x343   :  { %v541_v49 = vmul.f32 %v786_v47, %v539_v48  ;;  %v788_v50 = vpop.eup %787 }
 0x344   :  { %v542_v54 = vmul.f32 %v788_v50, %v540_v52 }
 0x346   :  { %576 = vadd.xlane.f32.xlu1 %v573_v41 }
 0x348   :  { %v575_v43 = vpop.xlane.xlu0 %574 }
 0x349   :  { %v578_v44 = vadd.f32 %v575_v43, %v562_v42 }
 0x34b   :  { %580 = vst.msk [vmem:[#allocation5] sm:$0xff] %vm324_vm0, %v578_v44 }
 0x352   :  { %v595_v3 = vld [vmem:[#allocation5] sm:$0xff] }
 0x3cb   :  { %v544_v51 = vpop.xlane.xlu1 %543 }
 0x3cc   :  { %v547_v53 = vadd.f32 %v544_v51, %v541_v49 }
 0x3ce   :  { %550 = vst.msk [vmem:[#allocation4] sm:$0xff] %vm324_vm0, %v547_v53 }
 0x3cf   :  { %v546_v55 = vpop.xlane.xlu1 %545 }
 0x3d0   :  { %v548_v56 = vadd.f32 %v546_v55, %v542_v54 }
 0x3d2   :  { %551 = vst.msk [vmem:[#allocation4 + $0x8] sm:$0xff] %vm324_vm0, %v548_v56 }
 0x3d3   :  { %v577_v58 = vpop.xlane.xlu1 %576 }
 0x3d4   :  { %v579_v59 = vadd.f32 %v577_v58, %v563_v57 }
 0x3d5   :  { %v587_v60 = vld [vmem:[#allocation4] sm:$0xff] }
 0x3d6   :  { %581 = vst.msk [vmem:[#allocation5 + $0x8] sm:$0xff] %vm324_vm0, %v579_v59  ;;  %789 = vlog2.f32 %v587_v60 }
 0x3d9   :  { %v588_v61 = vld [vmem:[#allocation4 + $0x8] sm:$0xff] }
 0x3da   :  { %791 = vlog2.f32 %v588_v61 }
 0x3dd   :  { %v596_v8 = vld [vmem:[#allocation5 + $0x8] sm:$0xff] }
 0x3e0   :  { %v790_v62 = vpop.eup %789 }
 0x3e1   :  { %v590_v63 = vmul.f32 0.6931472, %v790_v62 }
 0x3e3   :  { %v593_v1 = vadd.f32 %v590_v63, %v585_v0 }
 0x3e4   :  { %v792_v2 = vpop.eup %791 }
 0x3e5   :  { %v597_v4 = vsub.f32 %v593_v1, %v595_v3  ;;  %v592_v5 = vmul.f32 0.6931472, %v792_v2 }
 0x3e7   :  { %601 = vperm.xlu1 %712, %v597_v4   ;;  %v594_v7 = vadd.f32 %v592_v5, %v586_v6 }
 0x3e9   :  { %v598_v9 = vsub.f32 %v594_v7, %v596_v8 }
 0x3eb   :  { %606 = vperm.xlu1 %712, %v598_v9  }
 0x466   :  { %v602_v10 = vpop.permute.xlu1 %601 }
 0x467   :  { %609 = vst [vmem:[#allocation11] sm:$0xff] %v602_v10 }
 0x46a   :  { %v607_v11 = vpop.permute.xlu1 %606 }
 0x46b   :  { %610 = vst [vmem:[#allocation11 + $0x8] sm:$0xff] %v607_v11 }
 0x46c   :  { %848 = shalt.err (!%p845_p6)
}
 0x46d   :  { %s849_s14 = scalar_lea.hbm %s988_s6, 256 }
 0x46e   :  { %p850_p7 = scmp.ne.s32.totalorder %s988_s6, %s849_s14  ;;  %p853_p8 = scmp.lt.u32.totalorder %s849_s14, %s988_s6 }
 0x470   :  { %p855_p9 = pnand %p853_p8, %p850_p7 }
 0x472   :  { %858 = shalt.err (!%p855_p9)
}
 0x473   :  { %622 = dma.vmem_to_hbm [thread:$0]  %s617_s10, 256, %s988_s6, [#allocation8], %s866_s7, %s866_s7, %s867_s8  }
 0x474   :  { %863 = dma.done.wait [#allocation8], 256  }
 0x475   :  { %864 = vsyncadd [#allocation8], 4294967040 }
 0x476   :  { %626 = vsyncpa [#allocation7], 1 }
 0x477   :  { %627 = vsyncpa [#allocation10], 1 }
 0x478   :  { %628 = vsyncpa [#allocation8], 1 }

// kernel: tpu_custom_call.1
= control target key start
LH: loop header
LB: loop body
LE: loop exit
PB: predicated region body
PF: predicated region fallthrough
CT: control target
= control target key end

     0   :  { %11 = vsyncpa [#allocation7], 0  ;;  %s982_s0 = inlined_call_operand.vmem [shape: bf16[16,256], index: 0, kind: input, shape index: {}]   ;;  %s983_s1 = inlined_call_operand.vmem [shape: s32[16,1], index: 1, kind: input, shape index: {}]   ;;  %s984_s2 = inlined_call_operand.hbm [shape: bf16[256,256], index: 2, kind: input, shape index: {}]   ;;  %s985_s3 = inlined_call_operand.vmem [shape: f32[1,256], index: 3, kind: input, shape index: {}]   ;;  %s986_s4 = inlined_call_operand.hbm [shape: bf16[256,128], index: 4, kind: input, shape index: {}]   ;;  %s987_s5 = inlined_call_operand.vmem [shape: f32[1,128], index: 5, kind: input, shape index: {}]   ;;  %s988_s6 = inlined_call_operand.hbm [shape: f32[16,128], index: 6, kind: output, shape index: {}]  }
   0x1   :  { %12 = vsyncpa [#allocation10], 0 }
   0x2   :  { %13 = vsyncpa [#allocation8], 0  ;;  %s865_s21 = smov [#allocation6]   ;;  %s793_s25 = scalar_lea.hbm %s984_s2, 4096 }
   0x3   :  { %s23_s22 = sshll.u32 %s865_s21, 4  ;;  %p794_p0 = scmp.ne.s32.totalorder %s984_s2, %s793_s25  ;;  %s24_s22 = int_to_ptr.vmem [resolvable:$true] %s23_s22 }
   0x4   :  { %p797_p1 = scmp.lt.u32.totalorder %s793_s25, %s984_s2 }
   0x6   :  { %p799_p2 = pnand %p797_p1, %p794_p0 }
   0x8   :  { %802 = shalt.err (!%p799_p2)
}
   0x9   :  { %s803_s30 = scalar_lea.vmem %s24_s22, 4096  ;;  %p808_p4 = scmp.lt.s32.totalorder %s24_s22, %s24_s22 }
   0xa   :  { %p804_p3 = scmp.ne.s32.totalorder %s24_s22, %s803_s30  ;;  %p809_p5 = scmp.lt.s32.totalorder %s803_s30, %s803_s30 }
   0xc   :  { %p810_p6 = por %p809_p5, %p808_p4 }
   0xe   :  { %p811_p7 = pnand %p810_p6, %p804_p3 }
  0x10   :  { %814 = shalt.err (!%p811_p7)
}
  0x11   :  { %s866_s7 = smov 128   ;;  %s867_s8 = smov 8  }
  0x12   :  { %29 = dma.hbm_to_vmem [thread:$0]  %s984_s2, 4096, %s24_s22, [#allocation7], %s866_s7, %s866_s7, %s867_s8  }
  0x13   :  { %s868_s11 = smov [#allocation9]   ;;  %s815_s15 = scalar_lea.hbm %s986_s4, 2048 }
  0x14   :  { %s37_s12 = sshll.u32 %s868_s11, 4  ;;  %p816_p8 = scmp.ne.s32.totalorder %s986_s4, %s815_s15  ;;  %s38_s12 = int_to_ptr.vmem [resolvable:$true] %s37_s12 }
  0x15   :  { %p819_p9 = scmp.lt.u32.totalorder %s815_s15, %s986_s4 }
  0x17   :  { %p821_p10 = pnand %p819_p9, %p816_p8 }
  0x19   :  { %824 = shalt.err (!%p821_p10)
}
  0x1a   :  { %s825_s20 = scalar_lea.vmem %s38_s12, 2048  ;;  %p830_p12 = scmp.lt.s32.totalorder %s38_s12, %s38_s12 }
  0x1b   :  { %p826_p11 = scmp.ne.s32.totalorder %s38_s12, %s825_s20  ;;  %p831_p13 = scmp.lt.s32.totalorder %s825_s20, %s825_s20 }
  0x1d   :  { %p832_p0 = por %p831_p13, %p830_p12 }
  0x1f   :  { %p833_p1 = pnand %p832_p0, %p826_p11 }
  0x21   :  { %836 = shalt.err (!%p833_p1)
}
  0x22   :  { %s869_s2 = smov 64   ;;  %s870_s21 = smov 4  }
  0x23   :  { %43 = dma.hbm_to_vmem [thread:$0]  %s986_s4, 2048, %s38_s12, [#allocation10], %s869_s2, %s869_s2, %s870_s21  }
  0x24   :  { %859 = dma.done.wait [#allocation7], 4096  }
  0x25   :  { %860 = vsyncadd [#allocation7], 4294963200 }
  0x26   :  { %861 = dma.done.wait [#allocation10], 2048  }
  0x27   :  { %862 = vsyncadd [#allocation10], 4294965248  ;;  %v714_v0 = vld [vmem:[#allocation6 + $0x4] ss:$8 sps:$4 sm:$0xff]   ;;  %v716_v1 = vld [vmem:[#allocation6] ss:$8 sps:$4 sm:$0xff]   ;;  %v93_v50 = vlaneseq }
  0x28   :  { %273 = vmatprep.subr.bf16.mxu0 %v714_v0  ;;  %v717_v2 = vld [vmem:[#allocation6 + $0x14] ss:$8 sps:$4 sm:$0xff]   ;;  %v719_v3 = vld [vmem:[#allocation6 + $0x10] ss:$8 sps:$4 sm:$0xff]   ;;  %v720_v4 = vld [vmem:[#allocation6 + $0x24] ss:$8 sps:$4 sm:$0xff]  }
  0x29   :  { %274 = vmatpush1.bf16.msra.mxu0 %v716_v1  ;;  %v722_v5 = vld [vmem:[#allocation6 + $0x20] ss:$8 sps:$4 sm:$0xff]   ;;  %v723_v6 = vld [vmem:[#allocation6 + $0x34] ss:$8 sps:$4 sm:$0xff]   ;;  %v725_v7 = vld [vmem:[#allocation6 + $0x30] ss:$8 sps:$4 sm:$0xff]  }
  0x2a   :  { %275 = vmatprep.subr.bf16.mxu0 %v717_v2  ;;  %v726_v8 = vld [vmem:[#allocation6 + $0x44] ss:$8 sps:$4 sm:$0xff]   ;;  %v728_v9 = vld [vmem:[#allocation6 + $0x40] ss:$8 sps:$4 sm:$0xff]   ;;  %v729_v10 = vld [vmem:[#allocation6 + $0x54] ss:$8 sps:$4 sm:$0xff]  }
  0x2b   :  { %v731_v11 = vld [vmem:[#allocation6 + $0x50] ss:$8 sps:$4 sm:$0xff]   ;;  %v732_v12 = vld [vmem:[#allocation6 + $0x64] ss:$8 sps:$4 sm:$0xff]   ;;  %v734_v13 = vld [vmem:[#allocation6 + $0x60] ss:$8 sps:$4 sm:$0xff]  }
  0x2c   :  { %v735_v14 = vld [vmem:[#allocation6 + $0x74] ss:$8 sps:$4 sm:$0xff]   ;;  %v765_v16 = vld [vmem:[#allocation9 + $0x40] sm:$0xff]   ;;  %v737_v18 = vld [vmem:[#allocation6 + $0x70] ss:$8 sps:$4 sm:$0xff]   ;;  %v94_v51 = vshrl.u32 %v93_v50, 7 }
  0x2d   :  { %276 = vmatpush1.bf16.msra.mxu0 %v719_v3  ;;  %v764_v15 = vld [vmem:[%s982_s0 + $0x4] ss:$8 sps:$4 sm:$0xff]   ;;  %v766_v17 = vld [vmem:[#allocation9] sm:$0xff]   ;;  %680 = vmatprep.subr.bf16.mxu1 %v765_v16  ;;  %v767_v19 = vld [vmem:[#allocation9 + $0x48] sm:$0xff]   ;;  %vm324_vm0 = vcmask 7168  }
  0x2e   :  { %277 = vmatprep.subr.bf16.mxu0 %v720_v4  ;;  %305 = vmatprep.mubr.bf16.mxu0 %v764_v15  ;;  %v768_v20 = vld [vmem:[#allocation9 + $0x8] sm:$0xff]   ;;  %v769_v21 = vld [vmem:[#allocation9 + $0x50] sm:$0xff]   ;;  %v771_v25 = vld [vmem:[#allocation9 + $0x58] sm:$0xff]   ;;  %v95_v52 = vsub.s32 0, %v94_v51  ;;  %v99_v54 = vsub.s32 1, %v94_v51 }
  0x2f   :  { %681 = vmatpush3.bf16.msra.mxu1 %v766_v17  ;;  %v738_v22 = vld [vmem:[#allocation6 + $0x84] ss:$8 sps:$4 sm:$0xff]   ;;  %v740_v23 = vld [vmem:[#allocation6 + $0x80] ss:$8 sps:$4 sm:$0xff]   ;;  %v770_v24 = vld [vmem:[#allocation9 + $0x10] sm:$0xff]  }
  0x30   :  { %682 = vmatprep.subr.bf16.mxu1 %v767_v19  ;;  %v741_v26 = vld [vmem:[#allocation6 + $0x94] ss:$8 sps:$4 sm:$0xff]   ;;  %v743_v27 = vld [vmem:[#allocation6 + $0x90] ss:$8 sps:$4 sm:$0xff]   ;;  %v773_v29 = vld [vmem:[#allocation9 + $0x60] sm:$0xff]   ;;  %v873_v19 = vmov 0.0  }
  0x31   :  { %278 = vmatpush1.bf16.msra.mxu0 %v722_v5  ;;  %v772_v28 = vld [vmem:[#allocation9 + $0x18] sm:$0xff]   ;;  %v744_v30 = vld [vmem:[#allocation6 + $0xa4] ss:$8 sps:$4 sm:$0xff]   ;;  %v746_v32 = vld [vmem:[#allocation6 + $0xa0] ss:$8 sps:$4 sm:$0xff]   ;;  %329 = vst.msk [vmem:[#allocation5] sm:$0xff] %vm324_vm0, %v873_v19 }
  0x32   :  { %279 = vmatprep.subr.bf16.mxu0 %v723_v6  ;;  %v774_v31 = vld [vmem:[#allocation9 + $0x20] sm:$0xff]   ;;  %v775_v33 = vld [vmem:[#allocation9 + $0x68] sm:$0xff]   ;;  %v747_v34 = vld [vmem:[#allocation6 + $0xb4] ss:$8 sps:$4 sm:$0xff]   ;;  %327 = vst.msk [vmem:[#allocation4] sm:$0xff] %vm324_vm0, %v873_v19 }
  0x33   :  { %683 = vmatpush3.bf16.msra.mxu1 %v768_v20  ;;  %v749_v35 = vld [vmem:[#allocation6 + $0xb0] ss:$8 sps:$4 sm:$0xff]   ;;  %v750_v36 = vld [vmem:[#allocation6 + $0xc4] ss:$8 sps:$4 sm:$0xff]   ;;  %v752_v37 = vld [vmem:[#allocation6 + $0xc0] ss:$8 sps:$4 sm:$0xff]  }
  0x34   :  { %684 = vmatprep.subr.bf16.mxu1 %v769_v21  ;;  %v753_v38 = vld [vmem:[#allocation6 + $0xd4] ss:$8 sps:$4 sm:$0xff]   ;;  %v755_v39 = vld [vmem:[#allocation6 + $0xd0] ss:$8 sps:$4 sm:$0xff]   ;;  %v756_v40 = vld [vmem:[#allocation6 + $0xe4] ss:$8 sps:$4 sm:$0xff]  }
  0x35   :  { %280 = vmatpush1.bf16.msra.mxu0 %v725_v7  ;;  %v758_v41 = vld [vmem:[#allocation6 + $0xe0] ss:$8 sps:$4 sm:$0xff]   ;;  %v759_v42 = vld [vmem:[#allocation6 + $0xf4] ss:$8 sps:$4 sm:$0xff]   ;;  %v761_v43 = vld [vmem:[#allocation6 + $0xf0] ss:$8 sps:$4 sm:$0xff]  }
  0x36   :  { %281 = vmatprep.subr.bf16.mxu0 %v726_v8  ;;  %v762_v44 = vld [vmem:[%s982_s0] ss:$8 sps:$4 sm:$0xff]   ;;  %v776_v45 = vld [vmem:[#allocation9 + $0x28] sm:$0xff]   ;;  %v871_v7 = vmov 0   ;;  %v872_v8 = vmov -1e+30  }
  0x37   :  { %685 = vmatpush3.bf16.msra.mxu1 %v770_v24  ;;  %v777_v46 = vld [vmem:[#allocation9 + $0x70] sm:$0xff]   ;;  %v779_v48 = vld [vmem:[#allocation9 + $0x78] sm:$0xff]   ;;  %713 = vset.pattern.permute.xlu0 %v871_v7  ;;  %325 = vst.msk [vmem:[#allocation3] sm:$0xff] %vm324_vm0, %v872_v8  ;;  %326 = vst.msk [vmem:[#allocation3 + $0x8] sm:$0xff] %vm324_vm0, %v872_v8 }
  0x38   :  { %686 = vmatprep.subr.bf16.mxu1 %v771_v25  ;;  %v778_v47 = vld [vmem:[#allocation9 + $0x30] sm:$0xff]   ;;  %v780_v49 = vld [vmem:[#allocation9 + $0x38] sm:$0xff]   ;;  %712 = vset.pattern.permute.xlu1 %v871_v7  ;;  %328 = vst.msk [vmem:[#allocation4 + $0x8] sm:$0xff] %vm324_vm0, %v873_v19  ;;  %330 = vst.msk [vmem:[#allocation5 + $0x8] sm:$0xff] %vm324_vm0, %v873_v19 }
  0x39   :  { %282 = vmatpush1.bf16.msra.mxu0 %v728_v9  ;;  %v91_v53 = vld [vmem:[%s985_s3] sm:$0x3] }
  0x3a   :  { %283 = vmatprep.subr.bf16.mxu0 %v729_v10  ;;  %v96_v55 = vrot.slane %v91_v53, %v95_v52  ;;  %v100_v56 = vrot.slane %v91_v53, %v99_v54  ;;  %v663_v10 = vld [vmem:[%s987_s5] ss:$0 sm:$0xff] }
  0x3b   :  { %687 = vmatpush3.bf16.msra.mxu1 %v772_v28  ;;  %v557_v28 = vld [vmem:[%s983_s1 + $0x8] sm:$0xff] }
  0x3c   :  { %688 = vmatprep.subr.bf16.mxu1 %v773_v29  ;;  %v555_v29 = vand.u32 127, %v93_v50 }
  0x3d   :  { %284 = vmatpush1.bf16.msra.mxu0 %v731_v11 }
  0x3e   :  { %285 = vmatprep.subr.bf16.mxu0 %v732_v12  ;;  %v509_v20 = vld [vmem:[#allocation3] sm:$0xff] }
  0x3f   :  { %689 = vmatpush3.bf16.msra.mxu1 %v774_v31  ;;  %v540_v52 = vld [vmem:[#allocation4 + $0x8] sm:$0xff] }
  0x40   :  { %690 = vmatprep.subr.bf16.mxu1 %v775_v33 }
  0x41   :  { %286 = vmatpush1.bf16.msra.mxu0 %v734_v13 }
  0x42   :  { %287 = vmatprep.subr.bf16.mxu0 %v735_v14 }
  0x43   :  { %691 = vmatpush3.bf16.msra.mxu1 %v776_v45 }
  0x44   :  { %692 = vmatprep.subr.bf16.mxu1 %v777_v46 }
  0x45   :  { %288 = vmatpush1.bf16.msra.mxu0 %v737_v18  ;;  %v556_v18 = vld [vmem:[%s983_s1] sm:$0xff]  ;;  %s874_s1 = smov [#allocation11]  }
  0x46   :  { %289 = vmatprep.subr.bf16.mxu0 %v738_v22  ;;  %s616_s10 = sshll.u32 %s874_s1, 4  ;;  %s617_s10 = int_to_ptr.vmem [resolvable:$true] %s616_s10 }
  0x47   :  { %693 = vmatpush3.bf16.msra.mxu1 %v778_v47  ;;  %s837_s11 = scalar_lea.vmem %s617_s10, 256  ;;  %p842_p3 = scmp.lt.s32.totalorder %s617_s10, %s617_s10 }
  0x48   :  { %694 = vmatprep.subr.bf16.mxu1 %v779_v48  ;;  %v539_v48 = vld [vmem:[#allocation4] sm:$0xff]  ;;  %p838_p2 = scmp.ne.s32.totalorder %s617_s10, %s837_s11  ;;  %p843_p4 = scmp.lt.s32.totalorder %s837_s11, %s837_s11 }
  0x49   :  { %290 = vmatpush1.bf16.msra.mxu0 %v740_v23  ;;  %v510_v23 = vld [vmem:[#allocation3 + $0x8] sm:$0xff] }
  0x4a   :  { %291 = vmatprep.subr.bf16.mxu0 %v741_v26  ;;  %p844_p5 = por %p843_p4, %p842_p3 }
  0x4b   :  { %695 = vmatpush3.bf16.msra.mxu1 %v780_v49 }
  0x4c   :  { %p845_p6 = pnand %p844_p5, %p838_p2 }
  0x4d   :  { %292 = vmatpush1.bf16.msra.mxu0 %v743_v27 }
  0x4e   :  { %293 = vmatprep.subr.bf16.mxu0 %v744_v30 }
  0x51   :  { %294 = vmatpush1.bf16.msra.mxu0 %v746_v32 }
  0x52   :  { %295 = vmatprep.subr.bf16.mxu0 %v747_v34 }
  0x55   :  { %296 = vmatpush1.bf16.msra.mxu0 %v749_v35 }
  0x56   :  { %297 = vmatprep.subr.bf16.mxu0 %v750_v36 }
  0x59   :  { %298 = vmatpush1.bf16.msra.mxu0 %v752_v37 }
  0x5a   :  { %299 = vmatprep.subr.bf16.mxu0 %v753_v38 }
  0x5d   :  { %300 = vmatpush1.bf16.msra.mxu0 %v755_v39 }
  0x5e   :  { %301 = vmatprep.subr.bf16.mxu0 %v756_v40 }
  0x61   :  { %302 = vmatpush1.bf16.msra.mxu0 %v758_v41 }
  0x62   :  { %303 = vmatprep.subr.bf16.mxu0 %v759_v42  ;;  %v562_v42 = vld [vmem:[#allocation5] sm:$0xff] }
  0x65   :  { %304 = vmatpush1.bf16.msra.mxu0 %v761_v43 }
  0x68   :  { %306 = vmatmul.mubr.bf16.vlgmr.msra.gmra.mrb[0].mxu0 %v762_v44 }
 0x13b   :  { %v307_v57 = vpop.f32.mrb[0].mxu0 }
 0x13c   :  { %v308_v58 = vadd.f32 %v307_v57, %v96_v55  ;;  %v309_v59 = vpop.f32.mrb[1].mxu0  ;;  %v563_v57 = vld [vmem:[#allocation5 + $0x8] sm:$0xff] }
 0x13d   :  { %v310_v60 = vadd.f32 %v309_v59, %v100_v56  ;;  %v311_v61 = vpop.f32.mrb[2].mxu0 }
 0x13e   :  { %v312_v62 = vadd.f32 %v311_v61, %v96_v55  ;;  %v313_v63 = vpop.f32.mrb[3].mxu0  ;;  %v316_v1 = vmax.f32 %v308_v58, 0.0 }
 0x13f   :  { %v314_v0 = vadd.f32 %v313_v63, %v100_v56  ;;  %v317_v3 = vmax.f32 %v310_v60, 0.0 }
 0x140   :  { %v318_v2 = vmax.f32 %v312_v62, 0.0 }
 0x141   :  { %v319_v4 = vmax.f32 %v314_v0, 0.0 }
 0x142   :  { %v320_v5 = vpack.c.bf16 %v318_v2, %v316_v1 }
 0x143   :  { %v321_v6 = vpack.c.bf16 %v319_v4, %v317_v3 }
 0x145   :  { %500 = vmatprep.mubr.bf16.mxu1 %v321_v6 }
 0x146   :  { %501 = vmatmul.mubr.bf16.vlgmr.msra.gmra.mrb[0].mxu1 %v320_v5 }
 0x219   :  { %v696_v9 = vpop.f32.mrb[0].mxu1 }
 0x21a   :  { %v697_v11 = vpop.f32.mrb[1].mxu1 }
 0x21b   :  { %v698_v12 = vadd.f32 %v697_v11, %v696_v9  ;;  %v699_v13 = vpop.f32.mrb[2].mxu1 }
 0x21c   :  { %v700_v14 = vpop.f32.mrb[3].mxu1 }
 0x21d   :  { %v503_v15 = vadd.f32 %v698_v12, %v663_v10  ;;  %v701_v16 = vadd.f32 %v700_v14, %v699_v13 }
 0x21f   :  { %511 = vmax.xlane.f32.xlu0 %v503_v15  ;;  %v506_v17 = vadd.f32 %v701_v16, %v663_v10 }
 0x223   :  { %513 = vmax.xlane.f32.xlu0 %v506_v17 }
 0x239   :  { %565 = vperm.xlu0 %713, %v556_v18  }
 0x2ac   :  { %v512_v21 = vpop.xlane.xlu0 %511 }
 0x2ad   :  { %v515_v22 = vmax.f32 %v509_v20, %v512_v21 }
 0x2af   :  { %v517_v24 = vsub.f32 %v509_v20, %v515_v22  ;;  %552 = vst.msk [vmem:[#allocation3] sm:$0xff] %vm324_vm0, %v515_v22  ;;  %525 = vperm.xlu1 %712, %v515_v22  }
 0x2b0   :  { %v514_v25 = vpop.xlane.xlu0 %513 }
 0x2b1   :  { %v516_v26 = vmax.f32 %v510_v23, %v514_v25  ;;  %v519_v45 = vmul.f32 1.442695, %v517_v24 }
 0x2b3   :  { %v518_v27 = vsub.f32 %v510_v23, %v516_v26  ;;  %553 = vst.msk [vmem:[#allocation3 + $0x8] sm:$0xff] %vm324_vm0, %v516_v26  ;;  %530 = vperm.xlu1 %712, %v516_v26  }
 0x2b5   :  { %v521_v46 = vmul.f32 1.442695, %v518_v27 }
 0x2b6   :  { %v585_v0 = vld [vmem:[#allocation3] sm:$0xff] }
 0x2b7   :  { %568 = vperm.xlu1 %712, %v557_v28  }
 0x2b8   :  { %v566_v30 = vpop.permute.xlu0 %565 }
 0x2b9   :  { %vm570_vm1 = vcmp.eq.s32.totalorder %v555_v29, %v566_v30 }
 0x2ba   :  { %v572_v31 = vsel %vm570_vm1, %v503_v15, 0.0  ;;  %v586_v6 = vld [vmem:[#allocation3 + $0x8] sm:$0xff] }
 0x2bb   :  { %574 = vadd.xlane.f32.xlu0 %v572_v31 }
 0x32e   :  { %v526_v32 = vpop.permute.xlu1 %525 }
 0x32f   :  { %v533_v33 = vsub.f32 %v503_v15, %v526_v32 }
 0x331   :  { %v535_v34 = vmul.f32 1.442695, %v533_v33 }
 0x332   :  { %v531_v35 = vpop.permute.xlu1 %530 }
 0x333   :  { %781 = vpow2.f32 %v535_v34  ;;  %v534_v36 = vsub.f32 %v506_v17, %v531_v35 }
 0x335   :  { %v537_v37 = vmul.f32 1.442695, %v534_v36 }
 0x336   :  { %v569_v39 = vpop.permute.xlu1 %568 }
 0x337   :  { %783 = vpow2.f32 %v537_v37  ;;  %vm571_vm2 = vcmp.eq.s32.totalorder %v555_v29, %v569_v39 }
 0x338   :  { %v573_v41 = vsel %vm571_vm2, %v506_v17, 0.0  ;;  %785 = vpow2.f32 %v519_v45 }
 0x339   :  { %787 = vpow2.f32 %v521_v46 }
 0x33d   :  { %v782_v38 = vpop.eup %781 }
 0x33e   :  { %543 = vadd.xlane.f32.xlu1 %v782_v38 }
 0x341   :  { %v784_v40 = vpop.eup %783 }
 0x342   :  { %545 = vadd.xlane.f32.xlu1 %v784_v40  ;;  %v786_v47 = vpop.eup %785 }
 0x343   :  { %v541_v49 = vmul.f32 %v786_v47, %v539_v48  ;;  %v788_v50 = vpop.eup %787 }
 0x344   :  { %v542_v54 = vmul.f32 %v788_v50, %v540_v52 }
 0x346   :  { %576 = vadd.xlane.f32.xlu1 %v573_v41 }
 0x348   :  { %v575_v43 = vpop.xlane.xlu0 %574 }
 0x349   :  { %v578_v44 = vadd.f32 %v575_v43, %v562_v42 }
 0x34b   :  { %580 = vst.msk [vmem:[#allocation5] sm:$0xff] %vm324_vm0, %v578_v44 }
 0x352   :  { %v595_v3 = vld [vmem:[#allocation5] sm:$0xff] }
 0x3cb   :  { %v544_v51 = vpop.xlane.xlu1 %543 }
 0x3cc   :  { %v547_v53 = vadd.f32 %v544_v51, %v541_v49 }
 0x3ce   :  { %550 = vst.msk [vmem:[#allocation4] sm:$0xff] %vm324_vm0, %v547_v53 }
 0x3cf   :  { %v546_v55 = vpop.xlane.xlu1 %545 }
 0x3d0   :  { %v548_v56 = vadd.f32 %v546_v55, %v542_v54 }
 0x3d2   :  { %551 = vst.msk [vmem:[#allocation4 + $0x8] sm:$0xff] %vm324_vm0, %v548_v56 }
 0x3d3   :  { %v577_v58 = vpop.xlane.xlu1 %576 }
 0x3d4   :  { %v579_v59 = vadd.f32 %v577_v58, %v563_v57 }
 0x3d5   :  { %v587_v60 = vld [vmem:[#allocation4] sm:$0xff] }
 0x3d6   :  { %581 = vst.msk [vmem:[#allocation5 + $0x8] sm:$0xff] %vm324_vm0, %v579_v59  ;;  %789 = vlog2.f32 %v587_v60 }
 0x3d9   :  { %v588_v61 = vld [vmem:[#allocation4 + $0x8] sm:$0xff] }
 0x3da   :  { %791 = vlog2.f32 %v588_v61 }
 0x3dd   :  { %v596_v8 = vld [vmem:[#allocation5 + $0x8] sm:$0xff] }
 0x3e0   :  { %v790_v62 = vpop.eup %789 }
 0x3e1   :  { %v590_v63 = vmul.f32 0.6931472, %v790_v62 }
 0x3e3   :  { %v593_v1 = vadd.f32 %v590_v63, %v585_v0 }
 0x3e4   :  { %v792_v2 = vpop.eup %791 }
 0x3e5   :  { %v597_v4 = vsub.f32 %v593_v1, %v595_v3  ;;  %v592_v5 = vmul.f32 0.6931472, %v792_v2 }
 0x3e7   :  { %601 = vperm.xlu1 %712, %v597_v4   ;;  %v594_v7 = vadd.f32 %v592_v5, %v586_v6 }
 0x3e9   :  { %v598_v9 = vsub.f32 %v594_v7, %v596_v8 }
 0x3eb   :  { %606 = vperm.xlu1 %712, %v598_v9  }
 0x466   :  { %v602_v10 = vpop.permute.xlu1 %601 }
 0x467   :  { %609 = vst [vmem:[#allocation11] sm:$0xff] %v602_v10 }
 0x46a   :  { %v607_v11 = vpop.permute.xlu1 %606 }
 0x46b   :  { %610 = vst [vmem:[#allocation11 + $0x8] sm:$0xff] %v607_v11 }
 0x46c   :  { %848 = shalt.err (!%p845_p6)
}
 0x46d   :  { %s849_s14 = scalar_lea.hbm %s988_s6, 256 }
 0x46e   :  { %p850_p7 = scmp.ne.s32.totalorder %s988_s6, %s849_s14  ;;  %p853_p8 = scmp.lt.u32.totalorder %s849_s14, %s988_s6 }
 0x470   :  { %p855_p9 = pnand %p853_p8, %p850_p7 }
 0x472   :  { %858 = shalt.err (!%p855_p9)
}
 0x473   :  { %622 = dma.vmem_to_hbm [thread:$0]  %s617_s10, 256, %s988_s6, [#allocation8], %s866_s7, %s866_s7, %s867_s8  }
 0x474   :  { %863 = dma.done.wait [#allocation8], 256  }
 0x475   :  { %864 = vsyncadd [#allocation8], 4294967040 }
 0x476   :  { %626 = vsyncpa [#allocation7], 1 }
 0x477   :  { %627 = vsyncpa [#allocation10], 1 }
 0x478   :  { %628 = vsyncpa [#allocation8], 1 }

</bundles_post_ra>
